<compile_context>
chip_gen: v6e
topology: v6e:2x2x1
jax: 0.10.0
libtpu: 0.0.40
codegen_flags: <defaults>
</compile_context>

<pallas_src>
import functools

import jax
import jax.numpy as jnp
from jax.experimental import pallas as pl
from jax.experimental.pallas import tpu as pltpu


def _round_up(x, m):
    return ((x + m - 1) // m) * m


# ----------------------------------------------------------------------------
# Fused forward kernel. Gate order follows PyTorch nn.LSTM: [i, f, g, o],
# packed along the last (lane) axis of the fused weights / pre-activations.
# ----------------------------------------------------------------------------
def _fused_forward_kernel(*refs, T, B, H, n_layers):
    # ---- unpack refs -------------------------------------------------------
    x_ref = refs[0]                                   # (T*B, E) bf16 embedded input
    p = 1
    layer_refs = []
    for _ in range(n_layers):
        layer_refs.append((refs[p], refs[p + 1], refs[p + 2]))  # (w_ih, w_hh, b)
        p += 3
    wdec_ref, bdec_ref = refs[p], refs[p + 1]
    p += 2
    logits_ref, hN_ref, cN_ref = refs[p], refs[p + 1], refs[p + 2]
    p += 3
    gx_ref, xbuf_ref = refs[p], refs[p + 1]           # (T,B,4H) f32 / (T,B,H) bf16

    f32 = jnp.float32
    bf16 = jnp.bfloat16
    G = 4 * H

    x_in = x_ref[...]                                 # (T*B, E) bf16

    # ---- LSTM layers -------------------------------------------------------
    for layer_idx in range(n_layers):
        wih_ref, whh_ref, b_ref = layer_refs[layer_idx]

        # Hoisted input projection: ONE lane-dense matmul for all timesteps
        # and all four gates.  (T*B, D) @ (D, 4H) + (1, 4H) -> (T, B, 4H).
        gx_ref[...] = (
            jnp.dot(x_in, wih_ref[...], preferred_element_type=f32)
            + b_ref[...]
        ).reshape(T, B, G)

        whh = whh_ref[...]                            # (H, 4H) bf16, loaded once

        def step(t, carry, whh=whh):
            h, c = carry                              # (B, H) f32
            # Single fused recurrent matmul: (B,H) @ (H,4H) -> lane-dense (B,4H).
            pre = gx_ref[t] + jnp.dot(h.astype(bf16), whh,
                                      preferred_element_type=f32)
            i_g = jax.nn.sigmoid(pre[:, 0 * H:1 * H])
            f_g = jax.nn.sigmoid(pre[:, 1 * H:2 * H])
            g_g = jnp.tanh(pre[:, 2 * H:3 * H])
            o_g = jax.nn.sigmoid(pre[:, 3 * H:4 * H])
            c_new = f_g * c + i_g * g_g
            h_new = o_g * jnp.tanh(c_new)
            xbuf_ref[t] = h_new.astype(bf16)          # layer output (bf16)
            return h_new, c_new

        h0 = jnp.zeros((B, H), f32)
        c0 = jnp.zeros((B, H), f32)
        h_fin, c_fin = jax.lax.fori_loop(0, T, step, (h0, c0),
                                         unroll=min(T, 8))

        hN_ref[layer_idx] = h_fin                     # final state once per layer
        cN_ref[layer_idx] = c_fin

        x_in = xbuf_ref[...].reshape(T * B, H)        # bf16 input to next stage

    # ---- decoder: one big lane-dense matmul over all T*B rows ---------------
    logits_ref[...] = (jnp.dot(x_in, wdec_ref[...], preferred_element_type=f32)
                       + bdec_ref[...]).astype(logits_ref.dtype)


# ----------------------------------------------------------------------------
# Parameter init (PyTorch nn.LSTM-style layout: w_ih (4H,D), w_hh (4H,H)).
# ----------------------------------------------------------------------------
def init_params(key, input_size, embed_size, hidden_size, output_size, n_layers):
    ks = jax.random.split(key, 1 + 4 * n_layers + 2)
    scale = 1.0 / jnp.sqrt(hidden_size)
    params = {"embedding": jax.random.normal(ks[0], (input_size, embed_size),
                                             jnp.float32)}
    layers = []
    idx = 1
    for l in range(n_layers):
        d_in = embed_size if l == 0 else hidden_size
        w_ih = jax.random.uniform(ks[idx], (4 * hidden_size, d_in),
                                  jnp.float32, -scale, scale); idx += 1
        w_hh = jax.random.uniform(ks[idx], (4 * hidden_size, hidden_size),
                                  jnp.float32, -scale, scale); idx += 1
        b_ih = jax.random.uniform(ks[idx], (4 * hidden_size,),
                                  jnp.float32, -scale, scale); idx += 1
        b_hh = jax.random.uniform(ks[idx], (4 * hidden_size,),
                                  jnp.float32, -scale, scale); idx += 1
        layers.append({"w_ih": w_ih, "w_hh": w_hh, "b": b_ih + b_hh})
    params["layers"] = layers
    params["w_dec"] = jax.random.uniform(ks[idx], (output_size, hidden_size),
                                         jnp.float32, -scale, scale); idx += 1
    params["b_dec"] = jax.random.uniform(ks[idx], (output_size,),
                                         jnp.float32, -scale, scale)
    return params


# ----------------------------------------------------------------------------
# Forward wrapper (matches PyTorch module outputs).
# ----------------------------------------------------------------------------
def next_character_lstm_forward(params, input_ids):
    """input_ids: (B, T) int32 token ids.

    Returns (output (B, O, T), (hidden (B, L, H), cell (B, L, H))).
    """
    B, T = input_ids.shape
    V, E = params["embedding"].shape
    H = params["layers"][0]["w_hh"].shape[1]
    O = params["w_dec"].shape[0]
    L = len(params["layers"])

    Bp = max(8, _round_up(B, 8))      # sublane-aligned batch
    Op = _round_up(O, 128)            # lane-dense decoder output

    # --- embedding lookup as an XLA-side gather (no one-hot, no table in VMEM)
    x = jnp.take(params["embedding"], input_ids, axis=0)       # (B, T, E) f32
    x = jnp.transpose(x, (1, 0, 2))                            # (T, B, E) time-major
    if Bp != B:
        x = jnp.pad(x, ((0, 0), (0, Bp - B), (0, 0)))
    x = x.reshape(T * Bp, E).astype(jnp.bfloat16)

    # --- one-time weight prep: fused-gate transpose + bf16 cast ---------------
    flat_inputs = [x]
    for layer in params["layers"]:
        w_ih = layer["w_ih"]                         # (4H, D) torch [i,f,g,o] rows
        w_hh = layer["w_hh"]                         # (4H, H)
        b = layer["b"].astype(jnp.float32)           # (4H,)  (b_ih + b_hh)
        wih_f = jnp.transpose(w_ih, (1, 0)).astype(jnp.bfloat16)   # (D, 4H)
        whh_f = jnp.transpose(w_hh, (1, 0)).astype(jnp.bfloat16)   # (H, 4H)
        b_f = b.reshape(1, 4 * H)
        flat_inputs += [wih_f, whh_f, b_f]
    wdec = jnp.transpose(params["w_dec"], (1, 0)).astype(jnp.bfloat16)   # (H, O)
    bdec = params["b_dec"].reshape(1, O).astype(jnp.float32)
    if Op != O:
        wdec = jnp.pad(wdec, ((0, 0), (0, Op - O)))
        bdec = jnp.pad(bdec, ((0, 0), (0, Op - O)))
    flat_inputs += [wdec, bdec]

    kernel = functools.partial(_fused_forward_kernel, T=T, B=Bp, H=H, n_layers=L)

    vmem = pl.BlockSpec(memory_space=pltpu.MemorySpace.VMEM)
    logits2d, hN, cN = pl.pallas_call(
        kernel,
        out_shape=(
            jax.ShapeDtypeStruct((T * Bp, Op), jnp.float32),
            jax.ShapeDtypeStruct((L, Bp, H), jnp.float32),
            jax.ShapeDtypeStruct((L, Bp, H), jnp.float32),
        ),
        in_specs=[vmem] * len(flat_inputs),
        out_specs=(vmem, vmem, vmem),
        scratch_shapes=[
            pltpu.VMEM((T, Bp, 4 * H), jnp.float32),   # fused gate pre-activations
            pltpu.VMEM((T, Bp, H), jnp.bfloat16),      # layer output buffer
        ],
    )(*flat_inputs)

    logits = logits2d.reshape(T, Bp, Op)[:, :B, :O]                # strip padding
    output = jnp.transpose(logits, (1, 2, 0))                      # (B, O, T)
    hidden = jnp.transpose(hN[:, :B, :], (1, 0, 2))                # (B, L, H)
    cell = jnp.transpose(cN[:, :B, :], (1, 0, 2))                  # (B, L, H)
    return output, (hidden, cell)


# ----------------------------------------------------------------------------
# Pure-JAX f32 reference (mirrors torch semantics) for a sanity check.
# ----------------------------------------------------------------------------
def _reference_forward(params, input_ids):
    B, T = input_ids.shape
    H = params["layers"][0]["w_hh"].shape[1]
    x = jnp.take(params["embedding"], input_ids, axis=0)  # (B, T, E)
    x = jnp.transpose(x, (1, 0, 2))                       # (T, B, E)
    hs, cs = [], []
    for layer in params["layers"]:
        w_ih, w_hh, b = layer["w_ih"], layer["w_hh"], layer["b"]
        h = jnp.zeros((B, H), jnp.float32)
        c = jnp.zeros((B, H), jnp.float32)
        outs = []
        for t in range(T):
            g = x[t] @ w_ih.T + h @ w_hh.T + b
            i = jax.nn.sigmoid(g[:, 0 * H:1 * H])
            f = jax.nn.sigmoid(g[:, 1 * H:2 * H])
            gg = jnp.tanh(g[:, 2 * H:3 * H])
            o = jax.nn.sigmoid(g[:, 3 * H:4 * H])
            c = f * c + i * gg
            h = o * jnp.tanh(c)
            outs.append(h)
        x = jnp.stack(outs, axis=0)
        hs.append(h)
        cs.append(c)
    logits = x @ params["w_dec"].T + params["b_dec"]       # (T, B, O)
    return (jnp.transpose(logits, (1, 2, 0)),
            (jnp.stack(hs, axis=1), jnp.stack(cs, axis=1)))


if __name__ == "__main__":
    INPUT_SIZE = 64     # vocab
    EMBED_SIZE = 16
    HIDDEN_SIZE = 32
    OUTPUT_SIZE = 64
    N_LAYERS = 2
    BATCH = 2
    SEQ = 8

    key = jax.random.PRNGKey(0)
    pkey, dkey = jax.random.split(key)
    params = init_params(pkey, INPUT_SIZE, EMBED_SIZE, HIDDEN_SIZE,
                         OUTPUT_SIZE, N_LAYERS)
    input_ids = jax.random.randint(dkey, (BATCH, SEQ), 0, INPUT_SIZE,
                                   dtype=jnp.int32)

    fwd = jax.jit(next_character_lstm_forward)
    output, (hidden, cell) = fwd(params, input_ids)
    jax.block_until_ready((output, hidden, cell))

    assert output.shape == (BATCH, OUTPUT_SIZE, SEQ)
    assert hidden.shape == (BATCH, N_LAYERS, HIDDEN_SIZE)
    assert cell.shape == (BATCH, N_LAYERS, HIDDEN_SIZE)
    assert bool(jnp.all(jnp.isfinite(output)))

    # Loose-tolerance check vs f32 reference (kernel matmuls are bf16).
    ref_out, (ref_h, ref_c) = _reference_forward(params, input_ids)
    assert float(jnp.max(jnp.abs(output - ref_out))) < 0.1
    assert float(jnp.max(jnp.abs(hidden - ref_h))) < 0.1
    assert float(jnp.max(jnp.abs(cell - ref_c))) < 0.1

    print("KERNEL_OK")
</pallas_src>

<mosaic_0001>
module attributes {stable_mosaic.version = 11 : i64} {
  func.func @_fused_forward_kernel(%arg0: memref<64x16xbf16, #tpu.memory_space<vmem>>, %arg1: memref<16x128xbf16, #tpu.memory_space<vmem>>, %arg2: memref<32x128xbf16, #tpu.memory_space<vmem>>, %arg3: memref<1x128xf32, #tpu.memory_space<vmem>>, %arg4: memref<32x128xbf16, #tpu.memory_space<vmem>>, %arg5: memref<32x128xbf16, #tpu.memory_space<vmem>>, %arg6: memref<1x128xf32, #tpu.memory_space<vmem>>, %arg7: memref<32x128xbf16, #tpu.memory_space<vmem>>, %arg8: memref<1x128xf32, #tpu.memory_space<vmem>>, %arg9: memref<64x128xf32, #tpu.memory_space<vmem>>, %arg10: memref<2x8x32xf32, #tpu.memory_space<vmem>>, %arg11: memref<2x8x32xf32, #tpu.memory_space<vmem>>, %arg12: memref<8x8x128xf32, #tpu.memory_space<vmem>>, %arg13: memref<8x8x32xbf16, #tpu.memory_space<vmem>>) attributes {dimension_semantics = [], scalar_prefetch = 0 : i64, scratch_operands = 2 : i64, tpu.core_type = #tpu.core_type<tc>} {
    %c0 = arith.constant 0 : index
    %c0_0 = arith.constant 0 : index
    %0 = vector.load %arg0[%c0, %c0_0] : memref<64x16xbf16, #tpu.memory_space<vmem>>, vector<64x16xbf16>
    %c0_1 = arith.constant 0 : index
    %c0_2 = arith.constant 0 : index
    %1 = vector.load %arg1[%c0_1, %c0_2] : memref<16x128xbf16, #tpu.memory_space<vmem>>, vector<16x128xbf16>
    %cst = arith.constant dense<0.000000e+00> : vector<64x128xf32>
    %2 = tpu.matmul %0, %1, %cst {dimension_numbers = #tpu.dot_dimension_numbers<[1], [0], [0], [1], [0, 0, 1, 1], [], []>} : vector<64x16xbf16>, vector<16x128xbf16>, vector<64x128xf32> -> vector<64x128xf32>
    %c0_3 = arith.constant 0 : index
    %c0_4 = arith.constant 0 : index
    %3 = vector.load %arg3[%c0_3, %c0_4] : memref<1x128xf32, #tpu.memory_space<vmem>>, vector<1x128xf32>
    %4 = vector.broadcast %3 : vector<1x128xf32> to vector<64x128xf32>
    %5 = arith.addf %2, %4 : vector<64x128xf32>
    %6 = vector.shape_cast %5 : vector<64x128xf32> to vector<8x8x128xf32>
    %c0_5 = arith.constant 0 : index
    %c0_6 = arith.constant 0 : index
    %c0_7 = arith.constant 0 : index
    %7 = vector.load %arg12[%c0_5, %c0_6, %c0_7] : memref<8x8x128xf32, #tpu.memory_space<vmem>>, vector<8x8x128xf32>
    tpu.vector_store %arg12[%c0_5, %c0_6, %c0_7], %6 {strides = array<i32>} : memref<8x8x128xf32, #tpu.memory_space<vmem>>, vector<8x8x128xf32>,
    %c0_8 = arith.constant 0 : index
    %c0_9 = arith.constant 0 : index
    %8 = vector.load %arg2[%c0_8, %c0_9] : memref<32x128xbf16, #tpu.memory_space<vmem>>, vector<32x128xbf16>
    %cst_10 = arith.constant 0.000000e+00 : f32
    %9 = vector.broadcast %cst_10 : f32 to vector<8x32xf32>
    %cst_11 = arith.constant 0.000000e+00 : f32
    %10 = vector.broadcast %cst_11 : f32 to vector<8x32xf32>
    %c0_i32 = arith.constant 0 : i32
    %11 = arith.index_cast %c0_i32 : i32 to index
    %c0_12 = arith.constant 0 : index
    %c0_13 = arith.constant 0 : index
    %12 = vector.load %arg12[%11, %c0_12, %c0_13] : memref<8x8x128xf32, #tpu.memory_space<vmem>>, vector<1x8x128xf32>
    %13 = vector.shape_cast %12 : vector<1x8x128xf32> to vector<8x128xf32>
    %14 = arith.truncf %9 : vector<8x32xf32> to vector<8x32xbf16>
    %cst_14 = arith.constant dense<0.000000e+00> : vector<8x128xf32>
    %15 = tpu.matmul %14, %8, %cst_14 {dimension_numbers = #tpu.dot_dimension_numbers<[1], [0], [0], [1], [0, 0, 1, 1], [], []>} : vector<8x32xbf16>, vector<32x128xbf16>, vector<8x128xf32> -> vector<8x128xf32>
    %16 = arith.addf %13, %15 : vector<8x128xf32>
    %17 = vector.extract_strided_slice %16 {offsets = [0, 0], sizes = [8, 32], strides = [1, 1]} : vector<8x128xf32> to vector<8x32xf32>
    %18 = arith.negf %17 : vector<8x32xf32>
    %19 = math.exp %18 : vector<8x32xf32>
    %cst_15 = arith.constant 1.000000e+00 : f32
    %20 = vector.broadcast %cst_15 : f32 to vector<8x32xf32>
    %21 = arith.addf %20, %19 : vector<8x32xf32>
    %22 = arith.divf %20, %21 : vector<8x32xf32>
    %23 = vector.extract_strided_slice %16 {offsets = [0, 32], sizes = [8, 32], strides = [1, 1]} : vector<8x128xf32> to vector<8x32xf32>
    %24 = arith.negf %23 : vector<8x32xf32>
    %25 = math.exp %24 : vector<8x32xf32>
    %cst_16 = arith.constant 1.000000e+00 : f32
    %26 = vector.broadcast %cst_16 : f32 to vector<8x32xf32>
    %27 = arith.addf %26, %25 : vector<8x32xf32>
    %28 = arith.divf %26, %27 : vector<8x32xf32>
    %29 = vector.extract_strided_slice %16 {offsets = [0, 64], sizes = [8, 32], strides = [1, 1]} : vector<8x128xf32> to vector<8x32xf32>
    %30 = math.tanh %29 : vector<8x32xf32>
    %31 = vector.extract_strided_slice %16 {offsets = [0, 96], sizes = [8, 32], strides = [1, 1]} : vector<8x128xf32> to vector<8x32xf32>
    %32 = arith.negf %31 : vector<8x32xf32>
    %33 = math.exp %32 : vector<8x32xf32>
    %cst_17 = arith.constant 1.000000e+00 : f32
    %34 = vector.broadcast %cst_17 : f32 to vector<8x32xf32>
    %35 = arith.addf %34, %33 : vector<8x32xf32>
    %36 = arith.divf %34, %35 : vector<8x32xf32>
    %37 = arith.mulf %28, %10 : vector<8x32xf32>
    %38 = arith.mulf %22, %30 : vector<8x32xf32>
    %39 = arith.addf %37, %38 : vector<8x32xf32>
    %40 = math.tanh %39 : vector<8x32xf32>
    %41 = arith.mulf %36, %40 : vector<8x32xf32>
    %42 = arith.truncf %41 : vector<8x32xf32> to vector<8x32xbf16>
    %43 = arith.index_cast %c0_i32 : i32 to index
    %c0_18 = arith.constant 0 : index
    %c0_19 = arith.constant 0 : index
    %44 = vector.load %arg13[%43, %c0_18, %c0_19] : memref<8x8x32xbf16, #tpu.memory_space<vmem>>, vector<1x8x32xbf16>
    %45 = vector.shape_cast %44 : vector<1x8x32xbf16> to vector<8x32xbf16>
    %46 = vector.shape_cast %42 : vector<8x32xbf16> to vector<1x8x32xbf16>
    tpu.vector_store %arg13[%43, %c0_18, %c0_19], %46 {strides = array<i32>} : memref<8x8x32xbf16, #tpu.memory_space<vmem>>, vector<1x8x32xbf16>,
    %c1_i32 = arith.constant 1 : i32
    %47 = arith.index_cast %c1_i32 : i32 to index
    %c0_20 = arith.constant 0 : index
    %c0_21 = arith.constant 0 : index
    %48 = vector.load %arg12[%47, %c0_20, %c0_21] : memref<8x8x128xf32, #tpu.memory_space<vmem>>, vector<1x8x128xf32>
    %49 = vector.shape_cast %48 : vector<1x8x128xf32> to vector<8x128xf32>
    %50 = arith.truncf %41 : vector<8x32xf32> to vector<8x32xbf16>
    %cst_22 = arith.constant dense<0.000000e+00> : vector<8x128xf32>
    %51 = tpu.matmul %50, %8, %cst_22 {dimension_numbers = #tpu.dot_dimension_numbers<[1], [0], [0], [1], [0, 0, 1, 1], [], []>} : vector<8x32xbf16>, vector<32x128xbf16>, vector<8x128xf32> -> vector<8x128xf32>
    %52 = arith.addf %49, %51 : vector<8x128xf32>
    %53 = vector.extract_strided_slice %52 {offsets = [0, 0], sizes = [8, 32], strides = [1, 1]} : vector<8x128xf32> to vector<8x32xf32>
    %54 = arith.negf %53 : vector<8x32xf32>
    %55 = math.exp %54 : vector<8x32xf32>
    %cst_23 = arith.constant 1.000000e+00 : f32
    %56 = vector.broadcast %cst_23 : f32 to vector<8x32xf32>
    %57 = arith.addf %56, %55 : vector<8x32xf32>
    %58 = arith.divf %56, %57 : vector<8x32xf32>
    %59 = vector.extract_strided_slice %52 {offsets = [0, 32], sizes = [8, 32], strides = [1, 1]} : vector<8x128xf32> to vector<8x32xf32>
    %60 = arith.negf %59 : vector<8x32xf32>
    %61 = math.exp %60 : vector<8x32xf32>
    %cst_24 = arith.constant 1.000000e+00 : f32
    %62 = vector.broadcast %cst_24 : f32 to vector<8x32xf32>
    %63 = arith.addf %62, %61 : vector<8x32xf32>
    %64 = arith.divf %62, %63 : vector<8x32xf32>
    %65 = vector.extract_strided_slice %52 {offsets = [0, 64], sizes = [8, 32], strides = [1, 1]} : vector<8x128xf32> to vector<8x32xf32>
    %66 = math.tanh %65 : vector<8x32xf32>
    %67 = vector.extract_strided_slice %52 {offsets = [0, 96], sizes = [8, 32], strides = [1, 1]} : vector<8x128xf32> to vector<8x32xf32>
    %68 = arith.negf %67 : vector<8x32xf32>
    %69 = math.exp %68 : vector<8x32xf32>
    %cst_25 = arith.constant 1.000000e+00 : f32
    %70 = vector.broadcast %cst_25 : f32 to vector<8x32xf32>
    %71 = arith.addf %70, %69 : vector<8x32xf32>
    %72 = arith.divf %70, %71 : vector<8x32xf32>
    %73 = arith.mulf %64, %39 : vector<8x32xf32>
    %74 = arith.mulf %58, %66 : vector<8x32xf32>
    %75 = arith.addf %73, %74 : vector<8x32xf32>
    %76 = math.tanh %75 : vector<8x32xf32>
    %77 = arith.mulf %72, %76 : vector<8x32xf32>
    %78 = arith.truncf %77 : vector<8x32xf32> to vector<8x32xbf16>
    %79 = arith.index_cast %c1_i32 : i32 to index
    %c0_26 = arith.constant 0 : index
    %c0_27 = arith.constant 0 : index
    %80 = vector.load %arg13[%79, %c0_26, %c0_27] : memref<8x8x32xbf16, #tpu.memory_space<vmem>>, vector<1x8x32xbf16>
    %81 = vector.shape_cast %80 : vector<1x8x32xbf16> to vector<8x32xbf16>
    %82 = vector.shape_cast %78 : vector<8x32xbf16> to vector<1x8x32xbf16>
    tpu.vector_store %arg13[%79, %c0_26, %c0_27], %82 {strides = array<i32>} : memref<8x8x32xbf16, #tpu.memory_space<vmem>>, vector<1x8x32xbf16>,
    %c2_i32 = arith.constant 2 : i32
    %83 = arith.index_cast %c2_i32 : i32 to index
    %c0_28 = arith.constant 0 : index
    %c0_29 = arith.constant 0 : index
    %84 = vector.load %arg12[%83, %c0_28, %c0_29] : memref<8x8x128xf32, #tpu.memory_space<vmem>>, vector<1x8x128xf32>
    %85 = vector.shape_cast %84 : vector<1x8x128xf32> to vector<8x128xf32>
    %86 = arith.truncf %77 : vector<8x32xf32> to vector<8x32xbf16>
    %cst_30 = arith.constant dense<0.000000e+00> : vector<8x128xf32>
    %87 = tpu.matmul %86, %8, %cst_30 {dimension_numbers = #tpu.dot_dimension_numbers<[1], [0], [0], [1], [0, 0, 1, 1], [], []>} : vector<8x32xbf16>, vector<32x128xbf16>, vector<8x128xf32> -> vector<8x128xf32>
    %88 = arith.addf %85, %87 : vector<8x128xf32>
    %89 = vector.extract_strided_slice %88 {offsets = [0, 0], sizes = [8, 32], strides = [1, 1]} : vector<8x128xf32> to vector<8x32xf32>
    %90 = arith.negf %89 : vector<8x32xf32>
    %91 = math.exp %90 : vector<8x32xf32>
    %cst_31 = arith.constant 1.000000e+00 : f32
    %92 = vector.broadcast %cst_31 : f32 to vector<8x32xf32>
    %93 = arith.addf %92, %91 : vector<8x32xf32>
    %94 = arith.divf %92, %93 : vector<8x32xf32>
    %95 = vector.extract_strided_slice %88 {offsets = [0, 32], sizes = [8, 32], strides = [1, 1]} : vector<8x128xf32> to vector<8x32xf32>
    %96 = arith.negf %95 : vector<8x32xf32>
    %97 = math.exp %96 : vector<8x32xf32>
    %cst_32 = arith.constant 1.000000e+00 : f32
    %98 = vector.broadcast %cst_32 : f32 to vector<8x32xf32>
    %99 = arith.addf %98, %97 : vector<8x32xf32>
    %100 = arith.divf %98, %99 : vector<8x32xf32>
    %101 = vector.extract_strided_slice %88 {offsets = [0, 64], sizes = [8, 32], strides = [1, 1]} : vector<8x128xf32> to vector<8x32xf32>
    %102 = math.tanh %101 : vector<8x32xf32>
    %103 = vector.extract_strided_slice %88 {offsets = [0, 96], sizes = [8, 32], strides = [1, 1]} : vector<8x128xf32> to vector<8x32xf32>
    %104 = arith.negf %103 : vector<8x32xf32>
    %105 = math.exp %104 : vector<8x32xf32>
    %cst_33 = arith.constant 1.000000e+00 : f32
    %106 = vector.broadcast %cst_33 : f32 to vector<8x32xf32>
    %107 = arith.addf %106, %105 : vector<8x32xf32>
    %108 = arith.divf %106, %107 : vector<8x32xf32>
    %109 = arith.mulf %100, %75 : vector<8x32xf32>
    %110 = arith.mulf %94, %102 : vector<8x32xf32>
    %111 = arith.addf %109, %110 : vector<8x32xf32>
    %112 = math.tanh %111 : vector<8x32xf32>
    %113 = arith.mulf %108, %112 : vector<8x32xf32>
    %114 = arith.truncf %113 : vector<8x32xf32> to vector<8x32xbf16>
    %115 = arith.index_cast %c2_i32 : i32 to index
    %c0_34 = arith.constant 0 : index
    %c0_35 = arith.constant 0 : index
    %116 = vector.load %arg13[%115, %c0_34, %c0_35] : memref<8x8x32xbf16, #tpu.memory_space<vmem>>, vector<1x8x32xbf16>
    %117 = vector.shape_cast %116 : vector<1x8x32xbf16> to vector<8x32xbf16>
    %118 = vector.shape_cast %114 : vector<8x32xbf16> to vector<1x8x32xbf16>
    tpu.vector_store %arg13[%115, %c0_34, %c0_35], %118 {strides = array<i32>} : memref<8x8x32xbf16, #tpu.memory_space<vmem>>, vector<1x8x32xbf16>,
    %c3_i32 = arith.constant 3 : i32
    %119 = arith.index_cast %c3_i32 : i32 to index
    %c0_36 = arith.constant 0 : index
    %c0_37 = arith.constant 0 : index
    %120 = vector.load %arg12[%119, %c0_36, %c0_37] : memref<8x8x128xf32, #tpu.memory_space<vmem>>, vector<1x8x128xf32>
    %121 = vector.shape_cast %120 : vector<1x8x128xf32> to vector<8x128xf32>
    %122 = arith.truncf %113 : vector<8x32xf32> to vector<8x32xbf16>
    %cst_38 = arith.constant dense<0.000000e+00> : vector<8x128xf32>
    %123 = tpu.matmul %122, %8, %cst_38 {dimension_numbers = #tpu.dot_dimension_numbers<[1], [0], [0], [1], [0, 0, 1, 1], [], []>} : vector<8x32xbf16>, vector<32x128xbf16>, vector<8x128xf32> -> vector<8x128xf32>
    %124 = arith.addf %121, %123 : vector<8x128xf32>
    %125 = vector.extract_strided_slice %124 {offsets = [0, 0], sizes = [8, 32], strides = [1, 1]} : vector<8x128xf32> to vector<8x32xf32>
    %126 = arith.negf %125 : vector<8x32xf32>
    %127 = math.exp %126 : vector<8x32xf32>
    %cst_39 = arith.constant 1.000000e+00 : f32
    %128 = vector.broadcast %cst_39 : f32 to vector<8x32xf32>
    %129 = arith.addf %128, %127 : vector<8x32xf32>
    %130 = arith.divf %128, %129 : vector<8x32xf32>
    %131 = vector.extract_strided_slice %124 {offsets = [0, 32], sizes = [8, 32], strides = [1, 1]} : vector<8x128xf32> to vector<8x32xf32>
    %132 = arith.negf %131 : vector<8x32xf32>
    %133 = math.exp %132 : vector<8x32xf32>
    %cst_40 = arith.constant 1.000000e+00 : f32
    %134 = vector.broadcast %cst_40 : f32 to vector<8x32xf32>
    %135 = arith.addf %134, %133 : vector<8x32xf32>
    %136 = arith.divf %134, %135 : vector<8x32xf32>
    %137 = vector.extract_strided_slice %124 {offsets = [0, 64], sizes = [8, 32], strides = [1, 1]} : vector<8x128xf32> to vector<8x32xf32>
    %138 = math.tanh %137 : vector<8x32xf32>
    %139 = vector.extract_strided_slice %124 {offsets = [0, 96], sizes = [8, 32], strides = [1, 1]} : vector<8x128xf32> to vector<8x32xf32>
    %140 = arith.negf %139 : vector<8x32xf32>
    %141 = math.exp %140 : vector<8x32xf32>
    %cst_41 = arith.constant 1.000000e+00 : f32
    %142 = vector.broadcast %cst_41 : f32 to vector<8x32xf32>
    %143 = arith.addf %142, %141 : vector<8x32xf32>
    %144 = arith.divf %142, %143 : vector<8x32xf32>
    %145 = arith.mulf %136, %111 : vector<8x32xf32>
    %146 = arith.mulf %130, %138 : vector<8x32xf32>
    %147 = arith.addf %145, %146 : vector<8x32xf32>
    %148 = math.tanh %147 : vector<8x32xf32>
    %149 = arith.mulf %144, %148 : vector<8x32xf32>
    %150 = arith.truncf %149 : vector<8x32xf32> to vector<8x32xbf16>
    %151 = arith.index_cast %c3_i32 : i32 to index
    %c0_42 = arith.constant 0 : index
    %c0_43 = arith.constant 0 : index
    %152 = vector.load %arg13[%151, %c0_42, %c0_43] : memref<8x8x32xbf16, #tpu.memory_space<vmem>>, vector<1x8x32xbf16>
    %153 = vector.shape_cast %152 : vector<1x8x32xbf16> to vector<8x32xbf16>
    %154 = vector.shape_cast %150 : vector<8x32xbf16> to vector<1x8x32xbf16>
    tpu.vector_store %arg13[%151, %c0_42, %c0_43], %154 {strides = array<i32>} : memref<8x8x32xbf16, #tpu.memory_space<vmem>>, vector<1x8x32xbf16>,
    %c4_i32 = arith.constant 4 : i32
    %155 = arith.index_cast %c4_i32 : i32 to index
    %c0_44 = arith.constant 0 : index
    %c0_45 = arith.constant 0 : index
    %156 = vector.load %arg12[%155, %c0_44, %c0_45] : memref<8x8x128xf32, #tpu.memory_space<vmem>>, vector<1x8x128xf32>
    %157 = vector.shape_cast %156 : vector<1x8x128xf32> to vector<8x128xf32>
    %158 = arith.truncf %149 : vector<8x32xf32> to vector<8x32xbf16>
    %cst_46 = arith.constant dense<0.000000e+00> : vector<8x128xf32>
    %159 = tpu.matmul %158, %8, %cst_46 {dimension_numbers = #tpu.dot_dimension_numbers<[1], [0], [0], [1], [0, 0, 1, 1], [], []>} : vector<8x32xbf16>, vector<32x128xbf16>, vector<8x128xf32> -> vector<8x128xf32>
    %160 = arith.addf %157, %159 : vector<8x128xf32>
    %161 = vector.extract_strided_slice %160 {offsets = [0, 0], sizes = [8, 32], strides = [1, 1]} : vector<8x128xf32> to vector<8x32xf32>
    %162 = arith.negf %161 : vector<8x32xf32>
    %163 = math.exp %162 : vector<8x32xf32>
    %cst_47 = arith.constant 1.000000e+00 : f32
    %164 = vector.broadcast %cst_47 : f32 to vector<8x32xf32>
    %165 = arith.addf %164, %163 : vector<8x32xf32>
    %166 = arith.divf %164, %165 : vector<8x32xf32>
    %167 = vector.extract_strided_slice %160 {offsets = [0, 32], sizes = [8, 32], strides = [1, 1]} : vector<8x128xf32> to vector<8x32xf32>
    %168 = arith.negf %167 : vector<8x32xf32>
    %169 = math.exp %168 : vector<8x32xf32>
    %cst_48 = arith.constant 1.000000e+00 : f32
    %170 = vector.broadcast %cst_48 : f32 to vector<8x32xf32>
    %171 = arith.addf %170, %169 : vector<8x32xf32>
    %172 = arith.divf %170, %171 : vector<8x32xf32>
    %173 = vector.extract_strided_slice %160 {offsets = [0, 64], sizes = [8, 32], strides = [1, 1]} : vector<8x128xf32> to vector<8x32xf32>
    %174 = math.tanh %173 : vector<8x32xf32>
    %175 = vector.extract_strided_slice %160 {offsets = [0, 96], sizes = [8, 32], strides = [1, 1]} : vector<8x128xf32> to vector<8x32xf32>
    %176 = arith.negf %175 : vector<8x32xf32>
    %177 = math.exp %176 : vector<8x32xf32>
    %cst_49 = arith.constant 1.000000e+00 : f32
    %178 = vector.broadcast %cst_49 : f32 to vector<8x32xf32>
    %179 = arith.addf %178, %177 : vector<8x32xf32>
    %180 = arith.divf %178, %179 : vector<8x32xf32>
    %181 = arith.mulf %172, %147 : vector<8x32xf32>
    %182 = arith.mulf %166, %174 : vector<8x32xf32>
    %183 = arith.addf %181, %182 : vector<8x32xf32>
    %184 = math.tanh %183 : vector<8x32xf32>
    %185 = arith.mulf %180, %184 : vector<8x32xf32>
    %186 = arith.truncf %185 : vector<8x32xf32> to vector<8x32xbf16>
    %187 = arith.index_cast %c4_i32 : i32 to index
    %c0_50 = arith.constant 0 : index
    %c0_51 = arith.constant 0 : index
    %188 = vector.load %arg13[%187, %c0_50, %c0_51] : memref<8x8x32xbf16, #tpu.memory_space<vmem>>, vector<1x8x32xbf16>
    %189 = vector.shape_cast %188 : vector<1x8x32xbf16> to vector<8x32xbf16>
    %190 = vector.shape_cast %186 : vector<8x32xbf16> to vector<1x8x32xbf16>
    tpu.vector_store %arg13[%187, %c0_50, %c0_51], %190 {strides = array<i32>} : memref<8x8x32xbf16, #tpu.memory_space<vmem>>, vector<1x8x32xbf16>,
    %c5_i32 = arith.constant 5 : i32
    %191 = arith.index_cast %c5_i32 : i32 to index
    %c0_52 = arith.constant 0 : index
    %c0_53 = arith.constant 0 : index
    %192 = vector.load %arg12[%191, %c0_52, %c0_53] : memref<8x8x128xf32, #tpu.memory_space<vmem>>, vector<1x8x128xf32>
    %193 = vector.shape_cast %192 : vector<1x8x128xf32> to vector<8x128xf32>
    %194 = arith.truncf %185 : vector<8x32xf32> to vector<8x32xbf16>
    %cst_54 = arith.constant dense<0.000000e+00> : vector<8x128xf32>
    %195 = tpu.matmul %194, %8, %cst_54 {dimension_numbers = #tpu.dot_dimension_numbers<[1], [0], [0], [1], [0, 0, 1, 1], [], []>} : vector<8x32xbf16>, vector<32x128xbf16>, vector<8x128xf32> -> vector<8x128xf32>
    %196 = arith.addf %193, %195 : vector<8x128xf32>
    %197 = vector.extract_strided_slice %196 {offsets = [0, 0], sizes = [8, 32], strides = [1, 1]} : vector<8x128xf32> to vector<8x32xf32>
    %198 = arith.negf %197 : vector<8x32xf32>
    %199 = math.exp %198 : vector<8x32xf32>
    %cst_55 = arith.constant 1.000000e+00 : f32
    %200 = vector.broadcast %cst_55 : f32 to vector<8x32xf32>
    %201 = arith.addf %200, %199 : vector<8x32xf32>
    %202 = arith.divf %200, %201 : vector<8x32xf32>
    %203 = vector.extract_strided_slice %196 {offsets = [0, 32], sizes = [8, 32], strides = [1, 1]} : vector<8x128xf32> to vector<8x32xf32>
    %204 = arith.negf %203 : vector<8x32xf32>
    %205 = math.exp %204 : vector<8x32xf32>
    %cst_56 = arith.constant 1.000000e+00 : f32
    %206 = vector.broadcast %cst_56 : f32 to vector<8x32xf32>
    %207 = arith.addf %206, %205 : vector<8x32xf32>
    %208 = arith.divf %206, %207 : vector<8x32xf32>
    %209 = vector.extract_strided_slice %196 {offsets = [0, 64], sizes = [8, 32], strides = [1, 1]} : vector<8x128xf32> to vector<8x32xf32>
    %210 = math.tanh %209 : vector<8x32xf32>
    %211 = vector.extract_strided_slice %196 {offsets = [0, 96], sizes = [8, 32], strides = [1, 1]} : vector<8x128xf32> to vector<8x32xf32>
    %212 = arith.negf %211 : vector<8x32xf32>
    %213 = math.exp %212 : vector<8x32xf32>
    %cst_57 = arith.constant 1.000000e+00 : f32
    %214 = vector.broadcast %cst_57 : f32 to vector<8x32xf32>
    %215 = arith.addf %214, %213 : vector<8x32xf32>
    %216 = arith.divf %214, %215 : vector<8x32xf32>
    %217 = arith.mulf %208, %183 : vector<8x32xf32>
    %218 = arith.mulf %202, %210 : vector<8x32xf32>
    %219 = arith.addf %217, %218 : vector<8x32xf32>
    %220 = math.tanh %219 : vector<8x32xf32>
    %221 = arith.mulf %216, %220 : vector<8x32xf32>
    %222 = arith.truncf %221 : vector<8x32xf32> to vector<8x32xbf16>
    %223 = arith.index_cast %c5_i32 : i32 to index
    %c0_58 = arith.constant 0 : index
    %c0_59 = arith.constant 0 : index
    %224 = vector.load %arg13[%223, %c0_58, %c0_59] : memref<8x8x32xbf16, #tpu.memory_space<vmem>>, vector<1x8x32xbf16>
    %225 = vector.shape_cast %224 : vector<1x8x32xbf16> to vector<8x32xbf16>
    %226 = vector.shape_cast %222 : vector<8x32xbf16> to vector<1x8x32xbf16>
    tpu.vector_store %arg13[%223, %c0_58, %c0_59], %226 {strides = array<i32>} : memref<8x8x32xbf16, #tpu.memory_space<vmem>>, vector<1x8x32xbf16>,
    %c6_i32 = arith.constant 6 : i32
    %227 = arith.index_cast %c6_i32 : i32 to index
    %c0_60 = arith.constant 0 : index
    %c0_61 = arith.constant 0 : index
    %228 = vector.load %arg12[%227, %c0_60, %c0_61] : memref<8x8x128xf32, #tpu.memory_space<vmem>>, vector<1x8x128xf32>
    %229 = vector.shape_cast %228 : vector<1x8x128xf32> to vector<8x128xf32>
    %230 = arith.truncf %221 : vector<8x32xf32> to vector<8x32xbf16>
    %cst_62 = arith.constant dense<0.000000e+00> : vector<8x128xf32>
    %231 = tpu.matmul %230, %8, %cst_62 {dimension_numbers = #tpu.dot_dimension_numbers<[1], [0], [0], [1], [0, 0, 1, 1], [], []>} : vector<8x32xbf16>, vector<32x128xbf16>, vector<8x128xf32> -> vector<8x128xf32>
    %232 = arith.addf %229, %231 : vector<8x128xf32>
    %233 = vector.extract_strided_slice %232 {offsets = [0, 0], sizes = [8, 32], strides = [1, 1]} : vector<8x128xf32> to vector<8x32xf32>
    %234 = arith.negf %233 : vector<8x32xf32>
    %235 = math.exp %234 : vector<8x32xf32>
    %cst_63 = arith.constant 1.000000e+00 : f32
    %236 = vector.broadcast %cst_63 : f32 to vector<8x32xf32>
    %237 = arith.addf %236, %235 : vector<8x32xf32>
    %238 = arith.divf %236, %237 : vector<8x32xf32>
    %239 = vector.extract_strided_slice %232 {offsets = [0, 32], sizes = [8, 32], strides = [1, 1]} : vector<8x128xf32> to vector<8x32xf32>
    %240 = arith.negf %239 : vector<8x32xf32>
    %241 = math.exp %240 : vector<8x32xf32>
    %cst_64 = arith.constant 1.000000e+00 : f32
    %242 = vector.broadcast %cst_64 : f32 to vector<8x32xf32>
    %243 = arith.addf %242, %241 : vector<8x32xf32>
    %244 = arith.divf %242, %243 : vector<8x32xf32>
    %245 = vector.extract_strided_slice %232 {offsets = [0, 64], sizes = [8, 32], strides = [1, 1]} : vector<8x128xf32> to vector<8x32xf32>
    %246 = math.tanh %245 : vector<8x32xf32>
    %247 = vector.extract_strided_slice %232 {offsets = [0, 96], sizes = [8, 32], strides = [1, 1]} : vector<8x128xf32> to vector<8x32xf32>
    %248 = arith.negf %247 : vector<8x32xf32>
    %249 = math.exp %248 : vector<8x32xf32>
    %cst_65 = arith.constant 1.000000e+00 : f32
    %250 = vector.broadcast %cst_65 : f32 to vector<8x32xf32>
    %251 = arith.addf %250, %249 : vector<8x32xf32>
    %252 = arith.divf %250, %251 : vector<8x32xf32>
    %253 = arith.mulf %244, %219 : vector<8x32xf32>
    %254 = arith.mulf %238, %246 : vector<8x32xf32>
    %255 = arith.addf %253, %254 : vector<8x32xf32>
    %256 = math.tanh %255 : vector<8x32xf32>
    %257 = arith.mulf %252, %256 : vector<8x32xf32>
    %258 = arith.truncf %257 : vector<8x32xf32> to vector<8x32xbf16>
    %259 = arith.index_cast %c6_i32 : i32 to index
    %c0_66 = arith.constant 0 : index
    %c0_67 = arith.constant 0 : index
    %260 = vector.load %arg13[%259, %c0_66, %c0_67] : memref<8x8x32xbf16, #tpu.memory_space<vmem>>, vector<1x8x32xbf16>
    %261 = vector.shape_cast %260 : vector<1x8x32xbf16> to vector<8x32xbf16>
    %262 = vector.shape_cast %258 : vector<8x32xbf16> to vector<1x8x32xbf16>
    tpu.vector_store %arg13[%259, %c0_66, %c0_67], %262 {strides = array<i32>} : memref<8x8x32xbf16, #tpu.memory_space<vmem>>, vector<1x8x32xbf16>,
    %c7_i32 = arith.constant 7 : i32
    %263 = arith.index_cast %c7_i32 : i32 to index
    %c0_68 = arith.constant 0 : index
    %c0_69 = arith.constant 0 : index
    %264 = vector.load %arg12[%263, %c0_68, %c0_69] : memref<8x8x128xf32, #tpu.memory_space<vmem>>, vector<1x8x128xf32>
    %265 = vector.shape_cast %264 : vector<1x8x128xf32> to vector<8x128xf32>
    %266 = arith.truncf %257 : vector<8x32xf32> to vector<8x32xbf16>
    %cst_70 = arith.constant dense<0.000000e+00> : vector<8x128xf32>
    %267 = tpu.matmul %266, %8, %cst_70 {dimension_numbers = #tpu.dot_dimension_numbers<[1], [0], [0], [1], [0, 0, 1, 1], [], []>} : vector<8x32xbf16>, vector<32x128xbf16>, vector<8x128xf32> -> vector<8x128xf32>
    %268 = arith.addf %265, %267 : vector<8x128xf32>
    %269 = vector.extract_strided_slice %268 {offsets = [0, 0], sizes = [8, 32], strides = [1, 1]} : vector<8x128xf32> to vector<8x32xf32>
    %270 = arith.negf %269 : vector<8x32xf32>
    %271 = math.exp %270 : vector<8x32xf32>
    %cst_71 = arith.constant 1.000000e+00 : f32
    %272 = vector.broadcast %cst_71 : f32 to vector<8x32xf32>
    %273 = arith.addf %272, %271 : vector<8x32xf32>
    %274 = arith.divf %272, %273 : vector<8x32xf32>
    %275 = vector.extract_strided_slice %268 {offsets = [0, 32], sizes = [8, 32], strides = [1, 1]} : vector<8x128xf32> to vector<8x32xf32>
    %276 = arith.negf %275 : vector<8x32xf32>
    %277 = math.exp %276 : vector<8x32xf32>
    %cst_72 = arith.constant 1.000000e+00 : f32
    %278 = vector.broadcast %cst_72 : f32 to vector<8x32xf32>
    %279 = arith.addf %278, %277 : vector<8x32xf32>
    %280 = arith.divf %278, %279 : vector<8x32xf32>
    %281 = vector.extract_strided_slice %268 {offsets = [0, 64], sizes = [8, 32], strides = [1, 1]} : vector<8x128xf32> to vector<8x32xf32>
    %282 = math.tanh %281 : vector<8x32xf32>
    %283 = vector.extract_strided_slice %268 {offsets = [0, 96], sizes = [8, 32], strides = [1, 1]} : vector<8x128xf32> to vector<8x32xf32>
    %284 = arith.negf %283 : vector<8x32xf32>
    %285 = math.exp %284 : vector<8x32xf32>
    %cst_73 = arith.constant 1.000000e+00 : f32
    %286 = vector.broadcast %cst_73 : f32 to vector<8x32xf32>
    %287 = arith.addf %286, %285 : vector<8x32xf32>
    %288 = arith.divf %286, %287 : vector<8x32xf32>
    %289 = arith.mulf %280, %255 : vector<8x32xf32>
    %290 = arith.mulf %274, %282 : vector<8x32xf32>
    %291 = arith.addf %289, %290 : vector<8x32xf32>
    %292 = math.tanh %291 : vector<8x32xf32>
    %293 = arith.mulf %288, %292 : vector<8x32xf32>
    %294 = arith.truncf %293 : vector<8x32xf32> to vector<8x32xbf16>
    %295 = arith.index_cast %c7_i32 : i32 to index
    %c0_74 = arith.constant 0 : index
    %c0_75 = arith.constant 0 : index
    %296 = vector.load %arg13[%295, %c0_74, %c0_75] : memref<8x8x32xbf16, #tpu.memory_space<vmem>>, vector<1x8x32xbf16>
    %297 = vector.shape_cast %296 : vector<1x8x32xbf16> to vector<8x32xbf16>
    %298 = vector.shape_cast %294 : vector<8x32xbf16> to vector<1x8x32xbf16>
    tpu.vector_store %arg13[%295, %c0_74, %c0_75], %298 {strides = array<i32>} : memref<8x8x32xbf16, #tpu.memory_space<vmem>>, vector<1x8x32xbf16>,
    %c8_i32 = arith.constant 8 : i32
    %c0_76 = arith.constant 0 : index
    %c0_77 = arith.constant 0 : index
    %c0_78 = arith.constant 0 : index
    %299 = vector.load %arg10[%c0_76, %c0_77, %c0_78] : memref<2x8x32xf32, #tpu.memory_space<vmem>>, vector<1x8x32xf32>
    %300 = vector.shape_cast %299 : vector<1x8x32xf32> to vector<8x32xf32>
    %301 = vector.shape_cast %293 : vector<8x32xf32> to vector<1x8x32xf32>
    tpu.vector_store %arg10[%c0_76, %c0_77, %c0_78], %301 {strides = array<i32>} : memref<2x8x32xf32, #tpu.memory_space<vmem>>, vector<1x8x32xf32>,
    %c0_79 = arith.constant 0 : index
    %c0_80 = arith.constant 0 : index
    %c0_81 = arith.constant 0 : index
    %302 = vector.load %arg11[%c0_79, %c0_80, %c0_81] : memref<2x8x32xf32, #tpu.memory_space<vmem>>, vector<1x8x32xf32>
    %303 = vector.shape_cast %302 : vector<1x8x32xf32> to vector<8x32xf32>
    %304 = vector.shape_cast %291 : vector<8x32xf32> to vector<1x8x32xf32>
    tpu.vector_store %arg11[%c0_79, %c0_80, %c0_81], %304 {strides = array<i32>} : memref<2x8x32xf32, #tpu.memory_space<vmem>>, vector<1x8x32xf32>,
    %c0_82 = arith.constant 0 : index
    %c0_83 = arith.constant 0 : index
    %c0_84 = arith.constant 0 : index
    %305 = vector.load %arg13[%c0_82, %c0_83, %c0_84] : memref<8x8x32xbf16, #tpu.memory_space<vmem>>, vector<8x8x32xbf16>
    %306 = vector.shape_cast %305 : vector<8x8x32xbf16> to vector<64x32xbf16>
    %c0_85 = arith.constant 0 : index
    %c0_86 = arith.constant 0 : index
    %307 = vector.load %arg4[%c0_85, %c0_86] : memref<32x128xbf16, #tpu.memory_space<vmem>>, vector<32x128xbf16>
    %cst_87 = arith.constant dense<0.000000e+00> : vector<64x128xf32>
    %308 = tpu.matmul %306, %307, %cst_87 {dimension_numbers = #tpu.dot_dimension_numbers<[1], [0], [0], [1], [0, 0, 1, 1], [], []>} : vector<64x32xbf16>, vector<32x128xbf16>, vector<64x128xf32> -> vector<64x128xf32>
    %c0_88 = arith.constant 0 : index
    %c0_89 = arith.constant 0 : index
    %309 = vector.load %arg6[%c0_88, %c0_89] : memref<1x128xf32, #tpu.memory_space<vmem>>, vector<1x128xf32>
    %310 = vector.broadcast %309 : vector<1x128xf32> to vector<64x128xf32>
    %311 = arith.addf %308, %310 : vector<64x128xf32>
    %312 = vector.shape_cast %311 : vector<64x128xf32> to vector<8x8x128xf32>
    %c0_90 = arith.constant 0 : index
    %c0_91 = arith.constant 0 : index
    %c0_92 = arith.constant 0 : index
    %313 = vector.load %arg12[%c0_90, %c0_91, %c0_92] : memref<8x8x128xf32, #tpu.memory_space<vmem>>, vector<8x8x128xf32>
    tpu.vector_store %arg12[%c0_90, %c0_91, %c0_92], %312 {strides = array<i32>} : memref<8x8x128xf32, #tpu.memory_space<vmem>>, vector<8x8x128xf32>,
    %c0_93 = arith.constant 0 : index
    %c0_94 = arith.constant 0 : index
    %314 = vector.load %arg5[%c0_93, %c0_94] : memref<32x128xbf16, #tpu.memory_space<vmem>>, vector<32x128xbf16>
    %cst_95 = arith.constant 0.000000e+00 : f32
    %315 = vector.broadcast %cst_95 : f32 to vector<8x32xf32>
    %cst_96 = arith.constant 0.000000e+00 : f32
    %316 = vector.broadcast %cst_96 : f32 to vector<8x32xf32>
    %c0_i32_97 = arith.constant 0 : i32
    %317 = arith.index_cast %c0_i32_97 : i32 to index
    %c0_98 = arith.constant 0 : index
    %c0_99 = arith.constant 0 : index
    %318 = vector.load %arg12[%317, %c0_98, %c0_99] : memref<8x8x128xf32, #tpu.memory_space<vmem>>, vector<1x8x128xf32>
    %319 = vector.shape_cast %318 : vector<1x8x128xf32> to vector<8x128xf32>
    %320 = arith.truncf %315 : vector<8x32xf32> to vector<8x32xbf16>
    %cst_100 = arith.constant dense<0.000000e+00> : vector<8x128xf32>
    %321 = tpu.matmul %320, %314, %cst_100 {dimension_numbers = #tpu.dot_dimension_numbers<[1], [0], [0], [1], [0, 0, 1, 1], [], []>} : vector<8x32xbf16>, vector<32x128xbf16>, vector<8x128xf32> -> vector<8x128xf32>
    %322 = arith.addf %319, %321 : vector<8x128xf32>
    %323 = vector.extract_strided_slice %322 {offsets = [0, 0], sizes = [8, 32], strides = [1, 1]} : vector<8x128xf32> to vector<8x32xf32>
    %324 = arith.negf %323 : vector<8x32xf32>
    %325 = math.exp %324 : vector<8x32xf32>
    %cst_101 = arith.constant 1.000000e+00 : f32
    %326 = vector.broadcast %cst_101 : f32 to vector<8x32xf32>
    %327 = arith.addf %326, %325 : vector<8x32xf32>
    %328 = arith.divf %326, %327 : vector<8x32xf32>
    %329 = vector.extract_strided_slice %322 {offsets = [0, 32], sizes = [8, 32], strides = [1, 1]} : vector<8x128xf32> to vector<8x32xf32>
    %330 = arith.negf %329 : vector<8x32xf32>
    %331 = math.exp %330 : vector<8x32xf32>
    %cst_102 = arith.constant 1.000000e+00 : f32
    %332 = vector.broadcast %cst_102 : f32 to vector<8x32xf32>
    %333 = arith.addf %332, %331 : vector<8x32xf32>
    %334 = arith.divf %332, %333 : vector<8x32xf32>
    %335 = vector.extract_strided_slice %322 {offsets = [0, 64], sizes = [8, 32], strides = [1, 1]} : vector<8x128xf32> to vector<8x32xf32>
    %336 = math.tanh %335 : vector<8x32xf32>
    %337 = vector.extract_strided_slice %322 {offsets = [0, 96], sizes = [8, 32], strides = [1, 1]} : vector<8x128xf32> to vector<8x32xf32>
    %338 = arith.negf %337 : vector<8x32xf32>
    %339 = math.exp %338 : vector<8x32xf32>
    %cst_103 = arith.constant 1.000000e+00 : f32
    %340 = vector.broadcast %cst_103 : f32 to vector<8x32xf32>
    %341 = arith.addf %340, %339 : vector<8x32xf32>
    %342 = arith.divf %340, %341 : vector<8x32xf32>
    %343 = arith.mulf %334, %316 : vector<8x32xf32>
    %344 = arith.mulf %328, %336 : vector<8x32xf32>
    %345 = arith.addf %343, %344 : vector<8x32xf32>
    %346 = math.tanh %345 : vector<8x32xf32>
    %347 = arith.mulf %342, %346 : vector<8x32xf32>
    %348 = arith.truncf %347 : vector<8x32xf32> to vector<8x32xbf16>
    %349 = arith.index_cast %c0_i32_97 : i32 to index
    %c0_104 = arith.constant 0 : index
    %c0_105 = arith.constant 0 : index
    %350 = vector.load %arg13[%349, %c0_104, %c0_105] : memref<8x8x32xbf16, #tpu.memory_space<vmem>>, vector<1x8x32xbf16>
    %351 = vector.shape_cast %350 : vector<1x8x32xbf16> to vector<8x32xbf16>
    %352 = vector.shape_cast %348 : vector<8x32xbf16> to vector<1x8x32xbf16>
    tpu.vector_store %arg13[%349, %c0_104, %c0_105], %352 {strides = array<i32>} : memref<8x8x32xbf16, #tpu.memory_space<vmem>>, vector<1x8x32xbf16>,
    %c1_i32_106 = arith.constant 1 : i32
    %353 = arith.index_cast %c1_i32_106 : i32 to index
    %c0_107 = arith.constant 0 : index
    %c0_108 = arith.constant 0 : index
    %354 = vector.load %arg12[%353, %c0_107, %c0_108] : memref<8x8x128xf32, #tpu.memory_space<vmem>>, vector<1x8x128xf32>
    %355 = vector.shape_cast %354 : vector<1x8x128xf32> to vector<8x128xf32>
    %356 = arith.truncf %347 : vector<8x32xf32> to vector<8x32xbf16>
    %cst_109 = arith.constant dense<0.000000e+00> : vector<8x128xf32>
    %357 = tpu.matmul %356, %314, %cst_109 {dimension_numbers = #tpu.dot_dimension_numbers<[1], [0], [0], [1], [0, 0, 1, 1], [], []>} : vector<8x32xbf16>, vector<32x128xbf16>, vector<8x128xf32> -> vector<8x128xf32>
    %358 = arith.addf %355, %357 : vector<8x128xf32>
    %359 = vector.extract_strided_slice %358 {offsets = [0, 0], sizes = [8, 32], strides = [1, 1]} : vector<8x128xf32> to vector<8x32xf32>
    %360 = arith.negf %359 : vector<8x32xf32>
    %361 = math.exp %360 : vector<8x32xf32>
    %cst_110 = arith.constant 1.000000e+00 : f32
    %362 = vector.broadcast %cst_110 : f32 to vector<8x32xf32>
    %363 = arith.addf %362, %361 : vector<8x32xf32>
    %364 = arith.divf %362, %363 : vector<8x32xf32>
    %365 = vector.extract_strided_slice %358 {offsets = [0, 32], sizes = [8, 32], strides = [1, 1]} : vector<8x128xf32> to vector<8x32xf32>
    %366 = arith.negf %365 : vector<8x32xf32>
    %367 = math.exp %366 : vector<8x32xf32>
    %cst_111 = arith.constant 1.000000e+00 : f32
    %368 = vector.broadcast %cst_111 : f32 to vector<8x32xf32>
    %369 = arith.addf %368, %367 : vector<8x32xf32>
    %370 = arith.divf %368, %369 : vector<8x32xf32>
    %371 = vector.extract_strided_slice %358 {offsets = [0, 64], sizes = [8, 32], strides = [1, 1]} : vector<8x128xf32> to vector<8x32xf32>
    %372 = math.tanh %371 : vector<8x32xf32>
    %373 = vector.extract_strided_slice %358 {offsets = [0, 96], sizes = [8, 32], strides = [1, 1]} : vector<8x128xf32> to vector<8x32xf32>
    %374 = arith.negf %373 : vector<8x32xf32>
    %375 = math.exp %374 : vector<8x32xf32>
    %cst_112 = arith.constant 1.000000e+00 : f32
    %376 = vector.broadcast %cst_112 : f32 to vector<8x32xf32>
    %377 = arith.addf %376, %375 : vector<8x32xf32>
    %378 = arith.divf %376, %377 : vector<8x32xf32>
    %379 = arith.mulf %370, %345 : vector<8x32xf32>
    %380 = arith.mulf %364, %372 : vector<8x32xf32>
    %381 = arith.addf %379, %380 : vector<8x32xf32>
    %382 = math.tanh %381 : vector<8x32xf32>
    %383 = arith.mulf %378, %382 : vector<8x32xf32>
    %384 = arith.truncf %383 : vector<8x32xf32> to vector<8x32xbf16>
    %385 = arith.index_cast %c1_i32_106 : i32 to index
    %c0_113 = arith.constant 0 : index
    %c0_114 = arith.constant 0 : index
    %386 = vector.load %arg13[%385, %c0_113, %c0_114] : memref<8x8x32xbf16, #tpu.memory_space<vmem>>, vector<1x8x32xbf16>
    %387 = vector.shape_cast %386 : vector<1x8x32xbf16> to vector<8x32xbf16>
    %388 = vector.shape_cast %384 : vector<8x32xbf16> to vector<1x8x32xbf16>
    tpu.vector_store %arg13[%385, %c0_113, %c0_114], %388 {strides = array<i32>} : memref<8x8x32xbf16, #tpu.memory_space<vmem>>, vector<1x8x32xbf16>,
    %c2_i32_115 = arith.constant 2 : i32
    %389 = arith.index_cast %c2_i32_115 : i32 to index
    %c0_116 = arith.constant 0 : index
    %c0_117 = arith.constant 0 : index
    %390 = vector.load %arg12[%389, %c0_116, %c0_117] : memref<8x8x128xf32, #tpu.memory_space<vmem>>, vector<1x8x128xf32>
    %391 = vector.shape_cast %390 : vector<1x8x128xf32> to vector<8x128xf32>
    %392 = arith.truncf %383 : vector<8x32xf32> to vector<8x32xbf16>
    %cst_118 = arith.constant dense<0.000000e+00> : vector<8x128xf32>
    %393 = tpu.matmul %392, %314, %cst_118 {dimension_numbers = #tpu.dot_dimension_numbers<[1], [0], [0], [1], [0, 0, 1, 1], [], []>} : vector<8x32xbf16>, vector<32x128xbf16>, vector<8x128xf32> -> vector<8x128xf32>
    %394 = arith.addf %391, %393 : vector<8x128xf32>
    %395 = vector.extract_strided_slice %394 {offsets = [0, 0], sizes = [8, 32], strides = [1, 1]} : vector<8x128xf32> to vector<8x32xf32>
    %396 = arith.negf %395 : vector<8x32xf32>
    %397 = math.exp %396 : vector<8x32xf32>
    %cst_119 = arith.constant 1.000000e+00 : f32
    %398 = vector.broadcast %cst_119 : f32 to vector<8x32xf32>
    %399 = arith.addf %398, %397 : vector<8x32xf32>
    %400 = arith.divf %398, %399 : vector<8x32xf32>
    %401 = vector.extract_strided_slice %394 {offsets = [0, 32], sizes = [8, 32], strides = [1, 1]} : vector<8x128xf32> to vector<8x32xf32>
    %402 = arith.negf %401 : vector<8x32xf32>
    %403 = math.exp %402 : vector<8x32xf32>
    %cst_120 = arith.constant 1.000000e+00 : f32
    %404 = vector.broadcast %cst_120 : f32 to vector<8x32xf32>
    %405 = arith.addf %404, %403 : vector<8x32xf32>
    %406 = arith.divf %404, %405 : vector<8x32xf32>
    %407 = vector.extract_strided_slice %394 {offsets = [0, 64], sizes = [8, 32], strides = [1, 1]} : vector<8x128xf32> to vector<8x32xf32>
    %408 = math.tanh %407 : vector<8x32xf32>
    %409 = vector.extract_strided_slice %394 {offsets = [0, 96], sizes = [8, 32], strides = [1, 1]} : vector<8x128xf32> to vector<8x32xf32>
    %410 = arith.negf %409 : vector<8x32xf32>
    %411 = math.exp %410 : vector<8x32xf32>
    %cst_121 = arith.constant 1.000000e+00 : f32
    %412 = vector.broadcast %cst_121 : f32 to vector<8x32xf32>
    %413 = arith.addf %412, %411 : vector<8x32xf32>
    %414 = arith.divf %412, %413 : vector<8x32xf32>
    %415 = arith.mulf %406, %381 : vector<8x32xf32>
    %416 = arith.mulf %400, %408 : vector<8x32xf32>
    %417 = arith.addf %415, %416 : vector<8x32xf32>
    %418 = math.tanh %417 : vector<8x32xf32>
    %419 = arith.mulf %414, %418 : vector<8x32xf32>
    %420 = arith.truncf %419 : vector<8x32xf32> to vector<8x32xbf16>
    %421 = arith.index_cast %c2_i32_115 : i32 to index
    %c0_122 = arith.constant 0 : index
    %c0_123 = arith.constant 0 : index
    %422 = vector.load %arg13[%421, %c0_122, %c0_123] : memref<8x8x32xbf16, #tpu.memory_space<vmem>>, vector<1x8x32xbf16>
    %423 = vector.shape_cast %422 : vector<1x8x32xbf16> to vector<8x32xbf16>
    %424 = vector.shape_cast %420 : vector<8x32xbf16> to vector<1x8x32xbf16>
    tpu.vector_store %arg13[%421, %c0_122, %c0_123], %424 {strides = array<i32>} : memref<8x8x32xbf16, #tpu.memory_space<vmem>>, vector<1x8x32xbf16>,
    %c3_i32_124 = arith.constant 3 : i32
    %425 = arith.index_cast %c3_i32_124 : i32 to index
    %c0_125 = arith.constant 0 : index
    %c0_126 = arith.constant 0 : index
    %426 = vector.load %arg12[%425, %c0_125, %c0_126] : memref<8x8x128xf32, #tpu.memory_space<vmem>>, vector<1x8x128xf32>
    %427 = vector.shape_cast %426 : vector<1x8x128xf32> to vector<8x128xf32>
    %428 = arith.truncf %419 : vector<8x32xf32> to vector<8x32xbf16>
    %cst_127 = arith.constant dense<0.000000e+00> : vector<8x128xf32>
    %429 = tpu.matmul %428, %314, %cst_127 {dimension_numbers = #tpu.dot_dimension_numbers<[1], [0], [0], [1], [0, 0, 1, 1], [], []>} : vector<8x32xbf16>, vector<32x128xbf16>, vector<8x128xf32> -> vector<8x128xf32>
    %430 = arith.addf %427, %429 : vector<8x128xf32>
    %431 = vector.extract_strided_slice %430 {offsets = [0, 0], sizes = [8, 32], strides = [1, 1]} : vector<8x128xf32> to vector<8x32xf32>
    %432 = arith.negf %431 : vector<8x32xf32>
    %433 = math.exp %432 : vector<8x32xf32>
    %cst_128 = arith.constant 1.000000e+00 : f32
    %434 = vector.broadcast %cst_128 : f32 to vector<8x32xf32>
    %435 = arith.addf %434, %433 : vector<8x32xf32>
    %436 = arith.divf %434, %435 : vector<8x32xf32>
    %437 = vector.extract_strided_slice %430 {offsets = [0, 32], sizes = [8, 32], strides = [1, 1]} : vector<8x128xf32> to vector<8x32xf32>
    %438 = arith.negf %437 : vector<8x32xf32>
    %439 = math.exp %438 : vector<8x32xf32>
    %cst_129 = arith.constant 1.000000e+00 : f32
    %440 = vector.broadcast %cst_129 : f32 to vector<8x32xf32>
    %441 = arith.addf %440, %439 : vector<8x32xf32>
    %442 = arith.divf %440, %441 : vector<8x32xf32>
    %443 = vector.extract_strided_slice %430 {offsets = [0, 64], sizes = [8, 32], strides = [1, 1]} : vector<8x128xf32> to vector<8x32xf32>
    %444 = math.tanh %443 : vector<8x32xf32>
    %445 = vector.extract_strided_slice %430 {offsets = [0, 96], sizes = [8, 32], strides = [1, 1]} : vector<8x128xf32> to vector<8x32xf32>
    %446 = arith.negf %445 : vector<8x32xf32>
    %447 = math.exp %446 : vector<8x32xf32>
    %cst_130 = arith.constant 1.000000e+00 : f32
    %448 = vector.broadcast %cst_130 : f32 to vector<8x32xf32>
    %449 = arith.addf %448, %447 : vector<8x32xf32>
    %450 = arith.divf %448, %449 : vector<8x32xf32>
    %451 = arith.mulf %442, %417 : vector<8x32xf32>
    %452 = arith.mulf %436, %444 : vector<8x32xf32>
    %453 = arith.addf %451, %452 : vector<8x32xf32>
    %454 = math.tanh %453 : vector<8x32xf32>
    %455 = arith.mulf %450, %454 : vector<8x32xf32>
    %456 = arith.truncf %455 : vector<8x32xf32> to vector<8x32xbf16>
    %457 = arith.index_cast %c3_i32_124 : i32 to index
    %c0_131 = arith.constant 0 : index
    %c0_132 = arith.constant 0 : index
    %458 = vector.load %arg13[%457, %c0_131, %c0_132] : memref<8x8x32xbf16, #tpu.memory_space<vmem>>, vector<1x8x32xbf16>
    %459 = vector.shape_cast %458 : vector<1x8x32xbf16> to vector<8x32xbf16>
    %460 = vector.shape_cast %456 : vector<8x32xbf16> to vector<1x8x32xbf16>
    tpu.vector_store %arg13[%457, %c0_131, %c0_132], %460 {strides = array<i32>} : memref<8x8x32xbf16, #tpu.memory_space<vmem>>, vector<1x8x32xbf16>,
    %c4_i32_133 = arith.constant 4 : i32
    %461 = arith.index_cast %c4_i32_133 : i32 to index
    %c0_134 = arith.constant 0 : index
    %c0_135 = arith.constant 0 : index
    %462 = vector.load %arg12[%461, %c0_134, %c0_135] : memref<8x8x128xf32, #tpu.memory_space<vmem>>, vector<1x8x128xf32>
    %463 = vector.shape_cast %462 : vector<1x8x128xf32> to vector<8x128xf32>
    %464 = arith.truncf %455 : vector<8x32xf32> to vector<8x32xbf16>
    %cst_136 = arith.constant dense<0.000000e+00> : vector<8x128xf32>
    %465 = tpu.matmul %464, %314, %cst_136 {dimension_numbers = #tpu.dot_dimension_numbers<[1], [0], [0], [1], [0, 0, 1, 1], [], []>} : vector<8x32xbf16>, vector<32x128xbf16>, vector<8x128xf32> -> vector<8x128xf32>
    %466 = arith.addf %463, %465 : vector<8x128xf32>
    %467 = vector.extract_strided_slice %466 {offsets = [0, 0], sizes = [8, 32], strides = [1, 1]} : vector<8x128xf32> to vector<8x32xf32>
    %468 = arith.negf %467 : vector<8x32xf32>
    %469 = math.exp %468 : vector<8x32xf32>
    %cst_137 = arith.constant 1.000000e+00 : f32
    %470 = vector.broadcast %cst_137 : f32 to vector<8x32xf32>
    %471 = arith.addf %470, %469 : vector<8x32xf32>
    %472 = arith.divf %470, %471 : vector<8x32xf32>
    %473 = vector.extract_strided_slice %466 {offsets = [0, 32], sizes = [8, 32], strides = [1, 1]} : vector<8x128xf32> to vector<8x32xf32>
    %474 = arith.negf %473 : vector<8x32xf32>
    %475 = math.exp %474 : vector<8x32xf32>
    %cst_138 = arith.constant 1.000000e+00 : f32
    %476 = vector.broadcast %cst_138 : f32 to vector<8x32xf32>
    %477 = arith.addf %476, %475 : vector<8x32xf32>
    %478 = arith.divf %476, %477 : vector<8x32xf32>
    %479 = vector.extract_strided_slice %466 {offsets = [0, 64], sizes = [8, 32], strides = [1, 1]} : vector<8x128xf32> to vector<8x32xf32>
    %480 = math.tanh %479 : vector<8x32xf32>
    %481 = vector.extract_strided_slice %466 {offsets = [0, 96], sizes = [8, 32], strides = [1, 1]} : vector<8x128xf32> to vector<8x32xf32>
    %482 = arith.negf %481 : vector<8x32xf32>
    %483 = math.exp %482 : vector<8x32xf32>
    %cst_139 = arith.constant 1.000000e+00 : f32
    %484 = vector.broadcast %cst_139 : f32 to vector<8x32xf32>
    %485 = arith.addf %484, %483 : vector<8x32xf32>
    %486 = arith.divf %484, %485 : vector<8x32xf32>
    %487 = arith.mulf %478, %453 : vector<8x32xf32>
    %488 = arith.mulf %472, %480 : vector<8x32xf32>
    %489 = arith.addf %487, %488 : vector<8x32xf32>
    %490 = math.tanh %489 : vector<8x32xf32>
    %491 = arith.mulf %486, %490 : vector<8x32xf32>
    %492 = arith.truncf %491 : vector<8x32xf32> to vector<8x32xbf16>
    %493 = arith.index_cast %c4_i32_133 : i32 to index
    %c0_140 = arith.constant 0 : index
    %c0_141 = arith.constant 0 : index
    %494 = vector.load %arg13[%493, %c0_140, %c0_141] : memref<8x8x32xbf16, #tpu.memory_space<vmem>>, vector<1x8x32xbf16>
    %495 = vector.shape_cast %494 : vector<1x8x32xbf16> to vector<8x32xbf16>
    %496 = vector.shape_cast %492 : vector<8x32xbf16> to vector<1x8x32xbf16>
    tpu.vector_store %arg13[%493, %c0_140, %c0_141], %496 {strides = array<i32>} : memref<8x8x32xbf16, #tpu.memory_space<vmem>>, vector<1x8x32xbf16>,
    %c5_i32_142 = arith.constant 5 : i32
    %497 = arith.index_cast %c5_i32_142 : i32 to index
    %c0_143 = arith.constant 0 : index
    %c0_144 = arith.constant 0 : index
    %498 = vector.load %arg12[%497, %c0_143, %c0_144] : memref<8x8x128xf32, #tpu.memory_space<vmem>>, vector<1x8x128xf32>
    %499 = vector.shape_cast %498 : vector<1x8x128xf32> to vector<8x128xf32>
    %500 = arith.truncf %491 : vector<8x32xf32> to vector<8x32xbf16>
    %cst_145 = arith.constant dense<0.000000e+00> : vector<8x128xf32>
    %501 = tpu.matmul %500, %314, %cst_145 {dimension_numbers = #tpu.dot_dimension_numbers<[1], [0], [0], [1], [0, 0, 1, 1], [], []>} : vector<8x32xbf16>, vector<32x128xbf16>, vector<8x128xf32> -> vector<8x128xf32>
    %502 = arith.addf %499, %501 : vector<8x128xf32>
    %503 = vector.extract_strided_slice %502 {offsets = [0, 0], sizes = [8, 32], strides = [1, 1]} : vector<8x128xf32> to vector<8x32xf32>
    %504 = arith.negf %503 : vector<8x32xf32>
    %505 = math.exp %504 : vector<8x32xf32>
    %cst_146 = arith.constant 1.000000e+00 : f32
    %506 = vector.broadcast %cst_146 : f32 to vector<8x32xf32>
    %507 = arith.addf %506, %505 : vector<8x32xf32>
    %508 = arith.divf %506, %507 : vector<8x32xf32>
    %509 = vector.extract_strided_slice %502 {offsets = [0, 32], sizes = [8, 32], strides = [1, 1]} : vector<8x128xf32> to vector<8x32xf32>
    %510 = arith.negf %509 : vector<8x32xf32>
    %511 = math.exp %510 : vector<8x32xf32>
    %cst_147 = arith.constant 1.000000e+00 : f32
    %512 = vector.broadcast %cst_147 : f32 to vector<8x32xf32>
    %513 = arith.addf %512, %511 : vector<8x32xf32>
    %514 = arith.divf %512, %513 : vector<8x32xf32>
    %515 = vector.extract_strided_slice %502 {offsets = [0, 64], sizes = [8, 32], strides = [1, 1]} : vector<8x128xf32> to vector<8x32xf32>
    %516 = math.tanh %515 : vector<8x32xf32>
    %517 = vector.extract_strided_slice %502 {offsets = [0, 96], sizes = [8, 32], strides = [1, 1]} : vector<8x128xf32> to vector<8x32xf32>
    %518 = arith.negf %517 : vector<8x32xf32>
    %519 = math.exp %518 : vector<8x32xf32>
    %cst_148 = arith.constant 1.000000e+00 : f32
    %520 = vector.broadcast %cst_148 : f32 to vector<8x32xf32>
    %521 = arith.addf %520, %519 : vector<8x32xf32>
    %522 = arith.divf %520, %521 : vector<8x32xf32>
    %523 = arith.mulf %514, %489 : vector<8x32xf32>
    %524 = arith.mulf %508, %516 : vector<8x32xf32>
    %525 = arith.addf %523, %524 : vector<8x32xf32>
    %526 = math.tanh %525 : vector<8x32xf32>
    %527 = arith.mulf %522, %526 : vector<8x32xf32>
    %528 = arith.truncf %527 : vector<8x32xf32> to vector<8x32xbf16>
    %529 = arith.index_cast %c5_i32_142 : i32 to index
    %c0_149 = arith.constant 0 : index
    %c0_150 = arith.constant 0 : index
    %530 = vector.load %arg13[%529, %c0_149, %c0_150] : memref<8x8x32xbf16, #tpu.memory_space<vmem>>, vector<1x8x32xbf16>
    %531 = vector.shape_cast %530 : vector<1x8x32xbf16> to vector<8x32xbf16>
    %532 = vector.shape_cast %528 : vector<8x32xbf16> to vector<1x8x32xbf16>
    tpu.vector_store %arg13[%529, %c0_149, %c0_150], %532 {strides = array<i32>} : memref<8x8x32xbf16, #tpu.memory_space<vmem>>, vector<1x8x32xbf16>,
    %c6_i32_151 = arith.constant 6 : i32
    %533 = arith.index_cast %c6_i32_151 : i32 to index
    %c0_152 = arith.constant 0 : index
    %c0_153 = arith.constant 0 : index
    %534 = vector.load %arg12[%533, %c0_152, %c0_153] : memref<8x8x128xf32, #tpu.memory_space<vmem>>, vector<1x8x128xf32>
    %535 = vector.shape_cast %534 : vector<1x8x128xf32> to vector<8x128xf32>
    %536 = arith.truncf %527 : vector<8x32xf32> to vector<8x32xbf16>
    %cst_154 = arith.constant dense<0.000000e+00> : vector<8x128xf32>
    %537 = tpu.matmul %536, %314, %cst_154 {dimension_numbers = #tpu.dot_dimension_numbers<[1], [0], [0], [1], [0, 0, 1, 1], [], []>} : vector<8x32xbf16>, vector<32x128xbf16>, vector<8x128xf32> -> vector<8x128xf32>
    %538 = arith.addf %535, %537 : vector<8x128xf32>
    %539 = vector.extract_strided_slice %538 {offsets = [0, 0], sizes = [8, 32], strides = [1, 1]} : vector<8x128xf32> to vector<8x32xf32>
    %540 = arith.negf %539 : vector<8x32xf32>
    %541 = math.exp %540 : vector<8x32xf32>
    %cst_155 = arith.constant 1.000000e+00 : f32
    %542 = vector.broadcast %cst_155 : f32 to vector<8x32xf32>
    %543 = arith.addf %542, %541 : vector<8x32xf32>
    %544 = arith.divf %542, %543 : vector<8x32xf32>
    %545 = vector.extract_strided_slice %538 {offsets = [0, 32], sizes = [8, 32], strides = [1, 1]} : vector<8x128xf32> to vector<8x32xf32>
    %546 = arith.negf %545 : vector<8x32xf32>
    %547 = math.exp %546 : vector<8x32xf32>
    %cst_156 = arith.constant 1.000000e+00 : f32
    %548 = vector.broadcast %cst_156 : f32 to vector<8x32xf32>
    %549 = arith.addf %548, %547 : vector<8x32xf32>
    %550 = arith.divf %548, %549 : vector<8x32xf32>
    %551 = vector.extract_strided_slice %538 {offsets = [0, 64], sizes = [8, 32], strides = [1, 1]} : vector<8x128xf32> to vector<8x32xf32>
    %552 = math.tanh %551 : vector<8x32xf32>
    %553 = vector.extract_strided_slice %538 {offsets = [0, 96], sizes = [8, 32], strides = [1, 1]} : vector<8x128xf32> to vector<8x32xf32>
    %554 = arith.negf %553 : vector<8x32xf32>
    %555 = math.exp %554 : vector<8x32xf32>
    %cst_157 = arith.constant 1.000000e+00 : f32
    %556 = vector.broadcast %cst_157 : f32 to vector<8x32xf32>
    %557 = arith.addf %556, %555 : vector<8x32xf32>
    %558 = arith.divf %556, %557 : vector<8x32xf32>
    %559 = arith.mulf %550, %525 : vector<8x32xf32>
    %560 = arith.mulf %544, %552 : vector<8x32xf32>
    %561 = arith.addf %559, %560 : vector<8x32xf32>
    %562 = math.tanh %561 : vector<8x32xf32>
    %563 = arith.mulf %558, %562 : vector<8x32xf32>
    %564 = arith.truncf %563 : vector<8x32xf32> to vector<8x32xbf16>
    %565 = arith.index_cast %c6_i32_151 : i32 to index
    %c0_158 = arith.constant 0 : index
    %c0_159 = arith.constant 0 : index
    %566 = vector.load %arg13[%565, %c0_158, %c0_159] : memref<8x8x32xbf16, #tpu.memory_space<vmem>>, vector<1x8x32xbf16>
    %567 = vector.shape_cast %566 : vector<1x8x32xbf16> to vector<8x32xbf16>
    %568 = vector.shape_cast %564 : vector<8x32xbf16> to vector<1x8x32xbf16>
    tpu.vector_store %arg13[%565, %c0_158, %c0_159], %568 {strides = array<i32>} : memref<8x8x32xbf16, #tpu.memory_space<vmem>>, vector<1x8x32xbf16>,
    %c7_i32_160 = arith.constant 7 : i32
    %569 = arith.index_cast %c7_i32_160 : i32 to index
    %c0_161 = arith.constant 0 : index
    %c0_162 = arith.constant 0 : index
    %570 = vector.load %arg12[%569, %c0_161, %c0_162] : memref<8x8x128xf32, #tpu.memory_space<vmem>>, vector<1x8x128xf32>
    %571 = vector.shape_cast %570 : vector<1x8x128xf32> to vector<8x128xf32>
    %572 = arith.truncf %563 : vector<8x32xf32> to vector<8x32xbf16>
    %cst_163 = arith.constant dense<0.000000e+00> : vector<8x128xf32>
    %573 = tpu.matmul %572, %314, %cst_163 {dimension_numbers = #tpu.dot_dimension_numbers<[1], [0], [0], [1], [0, 0, 1, 1], [], []>} : vector<8x32xbf16>, vector<32x128xbf16>, vector<8x128xf32> -> vector<8x128xf32>
    %574 = arith.addf %571, %573 : vector<8x128xf32>
    %575 = vector.extract_strided_slice %574 {offsets = [0, 0], sizes = [8, 32], strides = [1, 1]} : vector<8x128xf32> to vector<8x32xf32>
    %576 = arith.negf %575 : vector<8x32xf32>
    %577 = math.exp %576 : vector<8x32xf32>
    %cst_164 = arith.constant 1.000000e+00 : f32
    %578 = vector.broadcast %cst_164 : f32 to vector<8x32xf32>
    %579 = arith.addf %578, %577 : vector<8x32xf32>
    %580 = arith.divf %578, %579 : vector<8x32xf32>
    %581 = vector.extract_strided_slice %574 {offsets = [0, 32], sizes = [8, 32], strides = [1, 1]} : vector<8x128xf32> to vector<8x32xf32>
    %582 = arith.negf %581 : vector<8x32xf32>
    %583 = math.exp %582 : vector<8x32xf32>
    %cst_165 = arith.constant 1.000000e+00 : f32
    %584 = vector.broadcast %cst_165 : f32 to vector<8x32xf32>
    %585 = arith.addf %584, %583 : vector<8x32xf32>
    %586 = arith.divf %584, %585 : vector<8x32xf32>
    %587 = vector.extract_strided_slice %574 {offsets = [0, 64], sizes = [8, 32], strides = [1, 1]} : vector<8x128xf32> to vector<8x32xf32>
    %588 = math.tanh %587 : vector<8x32xf32>
    %589 = vector.extract_strided_slice %574 {offsets = [0, 96], sizes = [8, 32], strides = [1, 1]} : vector<8x128xf32> to vector<8x32xf32>
    %590 = arith.negf %589 : vector<8x32xf32>
    %591 = math.exp %590 : vector<8x32xf32>
    %cst_166 = arith.constant 1.000000e+00 : f32
    %592 = vector.broadcast %cst_166 : f32 to vector<8x32xf32>
    %593 = arith.addf %592, %591 : vector<8x32xf32>
    %594 = arith.divf %592, %593 : vector<8x32xf32>
    %595 = arith.mulf %586, %561 : vector<8x32xf32>
    %596 = arith.mulf %580, %588 : vector<8x32xf32>
    %597 = arith.addf %595, %596 : vector<8x32xf32>
    %598 = math.tanh %597 : vector<8x32xf32>
    %599 = arith.mulf %594, %598 : vector<8x32xf32>
    %600 = arith.truncf %599 : vector<8x32xf32> to vector<8x32xbf16>
    %601 = arith.index_cast %c7_i32_160 : i32 to index
    %c0_167 = arith.constant 0 : index
    %c0_168 = arith.constant 0 : index
    %602 = vector.load %arg13[%601, %c0_167, %c0_168] : memref<8x8x32xbf16, #tpu.memory_space<vmem>>, vector<1x8x32xbf16>
    %603 = vector.shape_cast %602 : vector<1x8x32xbf16> to vector<8x32xbf16>
    %604 = vector.shape_cast %600 : vector<8x32xbf16> to vector<1x8x32xbf16>
    tpu.vector_store %arg13[%601, %c0_167, %c0_168], %604 {strides = array<i32>} : memref<8x8x32xbf16, #tpu.memory_space<vmem>>, vector<1x8x32xbf16>,
    %c8_i32_169 = arith.constant 8 : i32
    %c1 = arith.constant 1 : index
    %c0_170 = arith.constant 0 : index
    %c0_171 = arith.constant 0 : index
    %605 = vector.load %arg10[%c1, %c0_170, %c0_171] : memref<2x8x32xf32, #tpu.memory_space<vmem>>, vector<1x8x32xf32>
    %606 = vector.shape_cast %605 : vector<1x8x32xf32> to vector<8x32xf32>
    %607 = vector.shape_cast %599 : vector<8x32xf32> to vector<1x8x32xf32>
    tpu.vector_store %arg10[%c1, %c0_170, %c0_171], %607 {strides = array<i32>} : memref<2x8x32xf32, #tpu.memory_space<vmem>>, vector<1x8x32xf32>,
    %c1_172 = arith.constant 1 : index
    %c0_173 = arith.constant 0 : index
    %c0_174 = arith.constant 0 : index
    %608 = vector.load %arg11[%c1_172, %c0_173, %c0_174] : memref<2x8x32xf32, #tpu.memory_space<vmem>>, vector<1x8x32xf32>
    %609 = vector.shape_cast %608 : vector<1x8x32xf32> to vector<8x32xf32>
    %610 = vector.shape_cast %597 : vector<8x32xf32> to vector<1x8x32xf32>
    tpu.vector_store %arg11[%c1_172, %c0_173, %c0_174], %610 {strides = array<i32>} : memref<2x8x32xf32, #tpu.memory_space<vmem>>, vector<1x8x32xf32>,
    %c0_175 = arith.constant 0 : index
    %c0_176 = arith.constant 0 : index
    %c0_177 = arith.constant 0 : index
    %611 = vector.load %arg13[%c0_175, %c0_176, %c0_177] : memref<8x8x32xbf16, #tpu.memory_space<vmem>>, vector<8x8x32xbf16>
    %612 = vector.shape_cast %611 : vector<8x8x32xbf16> to vector<64x32xbf16>
    %c0_178 = arith.constant 0 : index
    %c0_179 = arith.constant 0 : index
    %613 = vector.load %arg7[%c0_178, %c0_179] : memref<32x128xbf16, #tpu.memory_space<vmem>>, vector<32x128xbf16>
    %cst_180 = arith.constant dense<0.000000e+00> : vector<64x128xf32>
    %614 = tpu.matmul %612, %613, %cst_180 {dimension_numbers = #tpu.dot_dimension_numbers<[1], [0], [0], [1], [0, 0, 1, 1], [], []>} : vector<64x32xbf16>, vector<32x128xbf16>, vector<64x128xf32> -> vector<64x128xf32>
    %c0_181 = arith.constant 0 : index
    %c0_182 = arith.constant 0 : index
    %615 = vector.load %arg8[%c0_181, %c0_182] : memref<1x128xf32, #tpu.memory_space<vmem>>, vector<1x128xf32>
    %616 = vector.broadcast %615 : vector<1x128xf32> to vector<64x128xf32>
    %617 = arith.addf %614, %616 : vector<64x128xf32>
    %c0_183 = arith.constant 0 : index
    %c0_184 = arith.constant 0 : index
    %618 = vector.load %arg9[%c0_183, %c0_184] : memref<64x128xf32, #tpu.memory_space<vmem>>, vector<64x128xf32>
    tpu.vector_store %arg9[%c0_183, %c0_184], %617 {strides = array<i32>} : memref<64x128xf32, #tpu.memory_space<vmem>>, vector<64x128xf32>,
    return
  }
}

</mosaic_0001>

<bundles_post_ra>
// kernel: next_character_lstm_forward.1
= control target key start
LH: loop header
LB: loop body
LE: loop exit
PB: predicated region body
PF: predicated region fallthrough
CT: control target
= control target key end

     0   :  { %vm79_vm0 = vcmask 130048   ;;  %v2260_v5 = vmov 0.0   ;;  %vm2261_vm1 = vmmov 0   ;;  %v2262_v8 = vmov 0   ;;  %s2264_s30 = smov 32   ;;  %s2753_s1 = inlined_call_operand.vmem [shape: bf16[16,128], index: 1, kind: input, shape index: {}]   ;;  %s2754_s0 = inlined_call_operand.vmem [shape: bf16[64,16], index: 0, kind: input, shape index: {}]   ;;  %s2755_s2 = inlined_call_operand.vmem [shape: bf16[32,128], index: 2, kind: input, shape index: {}]   ;;  %s2756_s3 = inlined_call_operand.vmem [shape: f32[1,128], index: 3, kind: input, shape index: {}]   ;;  %s2757_s4 = inlined_call_operand.vmem [shape: bf16[32,128], index: 4, kind: input, shape index: {}]   ;;  %s2758_s5 = inlined_call_operand.vmem [shape: bf16[32,128], index: 5, kind: input, shape index: {}]   ;;  %s2759_s6 = inlined_call_operand.vmem [shape: f32[1,128], index: 6, kind: input, shape index: {}]   ;;  %s2760_s7 = inlined_call_operand.vmem [shape: bf16[32,128], index: 7, kind: input, shape index: {}]   ;;  %s2761_s10 = inlined_call_operand.vmem [shape: f32[2,8,32], index: 10, kind: output, shape index: {1}]   ;;  %s2762_s11 = inlined_call_operand.vmem [shape: f32[2,8,32], index: 11, kind: output, shape index: {2}]   ;;  %s2763_s8 = inlined_call_operand.vmem [shape: f32[1,128], index: 8, kind: input, shape index: {}]   ;;  %s2764_s9 = inlined_call_operand.vmem [shape: f32[64,128], index: 9, kind: output, shape index: {0}]  }
   0x1   :  { %v2111_v0 = vld [vmem:[%s2753_s1] sm:$0xff]   ;;  %v2113_v2 = vld [vmem:[%s2754_s0 + $0x10] sm:$0xff]   ;;  %v2114_v3 = vld [vmem:[%s2754_s0 + $0x8] sm:$0xff]   ;;  %vm182_vm2 = vcmask 261120   ;;  %vm258_vm3 = vcmask 257024  }
   0x2   :  { %v2112_v1 = vld [vmem:[%s2754_s0] sm:$0xff]   ;;  %1941 = vmatprep.subr.bf16.mxu0 %v2111_v0  ;;  %2103 = vmatprep.subr.bf16.mxu1 %v2111_v0  ;;  %v2115_v4 = vld [vmem:[%s2754_s0 + $0x18] sm:$0xff]   ;;  %v2347_v6 = vld [vmem:[%s2755_s2 + $0x8] sm:$0xff]  }
   0x3   :  { %1942 = vmatpush3.bf16.msra.mxu0 %v2111_v0  ;;  %2104 = vmatpush3.bf16.msra.mxu1 %v2111_v0  ;;  %v2356_v7 = vld [vmem:[%s2755_s2] sm:$0xff]  }
   0x4   :  { %1943 = vmatprep.mubr.msk.bf16.mxu0 %vm79_vm0, %v2112_v1  ;;  %1947 = vmatprep.mubr.msk.bf16.mxu1 %vm79_vm0, %v2113_v2  ;;  %v1776_v9 = vld [vmem:[%s2756_s3] ss:$0 sm:$0xff]  ;;  %s2263_s3 = smov 64  }
   0x5   :  { %1951 = vmatprep.subr.bf16.mxu1 %v2260_v5  ;;  %1967 = vmatprep.subr.bf16.mxu0 %v2260_v5 }
   0x6   :  { %1944 = vmatmul.mubr.msk.bf16.vlgmr.msra.gmra.mxu0 %vm79_vm0, %v2114_v3  ;;  %1948 = vmatmul.mubr.msk.bf16.vlgmr.msra.gmra.mxu1 %vm79_vm0, %v2115_v4 }
   0x7   :  { %1952 = vmatpush3.bf16.msra.mxu1 %v2347_v6  ;;  %1955 = vmatprep.mubr.msk.bf16.mxu1 %vm2261_vm1, %v2260_v5 }
   0x8   :  { %1953 = vmatprep.subr.bf16.mxu1 %v2260_v5  ;;  %1968 = vmatpush3.bf16.msra.mxu0 %v2347_v6 }
   0x9   :  { %1969 = vmatprep.subr.bf16.mxu0 %v2260_v5  ;;  %1971 = vmatprep.mubr.msk.bf16.mxu0 %vm2261_vm1, %v2260_v5 }
   0xb   :  { %1954 = vmatpush3.bf16.msra.mxu1 %v2356_v7 }
   0xc   :  { %1959 = vmatprep.subr.bf16.mxu1 %v2260_v5  ;;  %1970 = vmatpush3.bf16.msra.mxu0 %v2356_v7 }
   0xd   :  { %1983 = vmatprep.subr.bf16.mxu0 %v2260_v5 }
   0xe   :  { %1956 = vmatmul.mubr.bf16.vlgmr.msra.gmra.mxu1 %v2262_v8 }
   0xf   :  { %1960 = vmatpush3.bf16.msra.mxu1 %v2347_v6  ;;  %1963 = vmatprep.mubr.msk.bf16.mxu1 %vm2261_vm1, %v2260_v5 }
  0x10   :  { %1961 = vmatprep.subr.bf16.mxu1 %v2260_v5 }
  0x13   :  { %1962 = vmatpush3.bf16.msra.mxu1 %v2356_v7 }
  0x14   :  { %1975 = vmatprep.subr.bf16.mxu1 %v2260_v5 }
  0xc6   :  { %v1945_v10 = vpop.f32.mrf.mxu0  ;;  %v1949_v11 = vpop.f32.mrf.mxu1 }
  0xc7   :  { %v2379_v12 = vadd.f32 %v1945_v10, %v1776_v9  ;;  %v2381_v13 = vadd.f32 %v1949_v11, %v1776_v9 }
  0xc8   :  { %v126_v14 = vpop.f32.mrf.mxu0  ;;  %v142_v15 = vpop.f32.mrf.mxu1 }
  0xc9   :  { %v2383_v16 = vadd.f32 %v1776_v9, %v142_v15  ;;  %v127_v22 = vadd.f32 %v1776_v9, %v126_v14 }
  0xca   :  { %v1946_v17 = vpop.f32.mrf.mxu0  ;;  %v1950_v18 = vpop.f32.mrf.mxu1 }
  0xcb   :  { %v2385_v19 = vadd.f32 %v1946_v17, %v1776_v9  ;;  %v2387_v20 = vadd.f32 %v1950_v18, %v1776_v9 }
  0xcc   :  { %v145_v21 = vpop.f32.mrf.mxu1  ;;  %v129_v44 = vpop.f32.mrf.mxu0 }
  0xcd   :  { %v2389_v23 = vadd.f32 %v1776_v9, %v145_v21  ;;  %v130_v45 = vadd.f32 %v1776_v9, %v129_v44 }
  0xce   :  { %v220_v24 = vpop.f32.mrf.mxu1 }
  0xcf   :  { %v226_v25 = vadd.f32 %v220_v24, %v127_v22 }
  0xd0   :  { %v1957_v26 = vpop.f32.mrf.mxu1 }
  0xd1   :  { %2132 = vtanh.f32 %v226_v25  ;;  %v1788_v30 = vmul.f32 -1.442695, %v226_v25 }
  0xd2   :  { %v223_v27 = vpop.f32.mrf.mxu1 }
  0xd3   :  { %2134 = vpow2.f32 %v1788_v30 }
  0xd4   :  { %v1958_v28 = vpop.f32.mrf.mxu1 }
  0xde   :  { %v2133_v29 = vpop.eup %2132 }
  0xdf   :  { %236 = vrot.lane.b32.xlu0 %v2133_v29, %s2263_s3 }
  0xe0   :  { %v2135_v31 = vpop.eup %2134 }
  0xe1   :  { %v230_v32 = vadd.f32 1.0, %v2135_v31 }
  0xe3   :  { %2136 = vrcp.f32 %v230_v32 }
  0xf0   :  { %v2137_v33 = vpop.eup %2136 }
  0xf1   :  { %v234_v36 = vmul.f32 0.0, %v2137_v33 }
 0x151   :  { %v237_v34 = vpop.permute.xlu0 %236 }
 0x152   :  { %v239_v35 = vmul.f32 %v2137_v33, %v237_v34 }
 0x154   :  { %241 = vrot.lane.b32.xlu0 %v239_v35, %s2264_s30 }
 0x1c6   :  { %v242_v37 = vpop.permute.xlu0 %241 }
 0x1c7   :  { %v244_v38 = vadd.f32 %v242_v37, %v234_v36 }
 0x1c9   :  { %2138 = vtanh.f32 %v244_v38 }
 0x1d6   :  { %v2139_v39 = vpop.eup %2138 }
 0x1d7   :  { %247 = vrot.lane.b32.xlu1 %v2139_v39, %s2263_s3 }
 0x249   :  { %v248_v40 = vpop.permute.xlu1 %247 }
 0x24a   :  { %v250_v41 = vmul.f32 %v2137_v33, %v248_v40 }
 0x24c   :  { %v2394_v42 = vpack.c.bf16 %v250_v41, %v250_v41 }
 0x24e   :  { %262 = vrot.lane.b32.xlu1 %v2394_v42, %s2264_s30 }
 0x2c0   :  { %v263_v43 = vpop.permute.xlu1 %262 }
 0x2c1   :  { %1964 = vmatmul.mubr.msk.bf16.vlgmr.msra.gmra.mxu1 %vm182_vm2, %v263_v43 }
 0x2c2   :  { %1976 = vmatpush3.bf16.msra.mxu1 %v2347_v6  ;;  %1979 = vmatprep.mubr.msk.bf16.mxu1 %vm2261_vm1, %v2260_v5 }
 0x2c3   :  { %1977 = vmatprep.subr.bf16.mxu1 %v2260_v5 }
 0x2c6   :  { %1978 = vmatpush3.bf16.msra.mxu1 %v2356_v7 }
 0x2c7   :  { %1991 = vmatprep.subr.bf16.mxu1 %v2260_v5 }
 0x381   :  { %v301_v46 = vpop.f32.mrf.mxu1 }
 0x382   :  { %v307_v47 = vadd.f32 %v301_v46, %v130_v45 }
 0x383   :  { %v1965_v48 = vpop.f32.mrf.mxu1 }
 0x384   :  { %2140 = vtanh.f32 %v307_v47  ;;  %v1791_v52 = vmul.f32 -1.442695, %v307_v47 }
 0x385   :  { %v304_v49 = vpop.f32.mrf.mxu1 }
 0x386   :  { %2142 = vpow2.f32 %v1791_v52 }
 0x387   :  { %v1966_v50 = vpop.f32.mrf.mxu1 }
 0x391   :  { %v2141_v51 = vpop.eup %2140 }
 0x392   :  { %317 = vrot.lane.b32.xlu0 %v2141_v51, %s2263_s3 }
 0x393   :  { %v2143_v53 = vpop.eup %2142 }
 0x394   :  { %v311_v54 = vadd.f32 1.0, %v2143_v53 }
 0x396   :  { %2144 = vrcp.f32 %v311_v54 }
 0x3a3   :  { %v2145_v55 = vpop.eup %2144 }
 0x3a4   :  { %v315_v58 = vmul.f32 %v2145_v55, %v244_v38 }
 0x404   :  { %v318_v56 = vpop.permute.xlu0 %317 }
 0x405   :  { %v320_v57 = vmul.f32 %v2145_v55, %v318_v56 }
 0x407   :  { %322 = vrot.lane.b32.xlu1 %v320_v57, %s2264_s30 }
 0x479   :  { %v323_v59 = vpop.permute.xlu1 %322 }
 0x47a   :  { %v325_v60 = vadd.f32 %v323_v59, %v315_v58 }
 0x47c   :  { %2146 = vtanh.f32 %v325_v60 }
 0x489   :  { %v2147_v61 = vpop.eup %2146 }
 0x48a   :  { %328 = vrot.lane.b32.xlu0 %v2147_v61, %s2263_s3 }
 0x4fc   :  { %v329_v62 = vpop.permute.xlu0 %328 }
 0x4fd   :  { %v331_v63 = vmul.f32 %v2145_v55, %v329_v62 }
 0x4ff   :  { %v2408_v0 = vpack.c.bf16 %v331_v63, %v331_v63 }
 0x501   :  { %343 = vrot.lane.b32.xlu1 %v2408_v0, %s2264_s30 }
 0x573   :  { %v344_v1 = vpop.permute.xlu1 %343 }
 0x574   :  { %1972 = vmatmul.mubr.msk.bf16.vlgmr.msra.gmra.mxu0 %vm182_vm2, %v344_v1 }
 0x575   :  { %1984 = vmatpush3.bf16.msra.mxu0 %v2347_v6  ;;  %1987 = vmatprep.mubr.msk.bf16.mxu0 %vm2261_vm1, %v2260_v5 }
 0x576   :  { %1985 = vmatprep.subr.bf16.mxu0 %v2260_v5 }
 0x579   :  { %1986 = vmatpush3.bf16.msra.mxu0 %v2356_v7 }
 0x57a   :  { %1999 = vmatprep.subr.bf16.mxu0 %v2260_v5 }
 0x634   :  { %v382_v2 = vpop.f32.mrf.mxu0 }
 0x635   :  { %v388_v3 = vadd.f32 %v382_v2, %v2379_v12 }
 0x636   :  { %v1973_v4 = vpop.f32.mrf.mxu0 }
 0x637   :  { %2148 = vtanh.f32 %v388_v3  ;;  %v1794_v14 = vmul.f32 -1.442695, %v388_v3 }
 0x638   :  { %v385_v9 = vpop.f32.mrf.mxu0 }
 0x639   :  { %2150 = vpow2.f32 %v1794_v14 }
 0x63a   :  { %v1974_v10 = vpop.f32.mrf.mxu0 }
 0x644   :  { %v2149_v11 = vpop.eup %2148 }
 0x645   :  { %398 = vrot.lane.b32.xlu0 %v2149_v11, %s2263_s3 }
 0x646   :  { %v2151_v15 = vpop.eup %2150 }
 0x647   :  { %v392_v17 = vadd.f32 1.0, %v2151_v15 }
 0x649   :  { %2152 = vrcp.f32 %v392_v17 }
 0x656   :  { %v2153_v18 = vpop.eup %2152 }
 0x657   :  { %v396_v24 = vmul.f32 %v2153_v18, %v325_v60 }
 0x6b7   :  { %v399_v21 = vpop.permute.xlu0 %398 }
 0x6b8   :  { %v401_v22 = vmul.f32 %v2153_v18, %v399_v21 }
 0x6ba   :  { %403 = vrot.lane.b32.xlu1 %v401_v22, %s2264_s30 }
 0x72c   :  { %v404_v25 = vpop.permute.xlu1 %403 }
 0x72d   :  { %v406_v12 = vadd.f32 %v404_v25, %v396_v24 }
 0x72f   :  { %2154 = vtanh.f32 %v406_v12 }
 0x73c   :  { %v2155_v26 = vpop.eup %2154 }
 0x73d   :  { %409 = vrot.lane.b32.xlu0 %v2155_v26, %s2263_s3 }
 0x7af   :  { %v410_v27 = vpop.permute.xlu0 %409 }
 0x7b0   :  { %v412_v28 = vmul.f32 %v2153_v18, %v410_v27 }
 0x7b2   :  { %v2423_v29 = vpack.c.bf16 %v412_v28, %v412_v28 }
 0x7b4   :  { %424 = vrot.lane.b32.xlu1 %v2423_v29, %s2264_s30 }
 0x826   :  { %v425_v30 = vpop.permute.xlu1 %424 }
 0x827   :  { %1980 = vmatmul.mubr.msk.bf16.vlgmr.msra.gmra.mxu1 %vm182_vm2, %v425_v30 }
 0x828   :  { %1992 = vmatpush3.bf16.msra.mxu1 %v2347_v6  ;;  %1995 = vmatprep.mubr.msk.bf16.mxu1 %vm2261_vm1, %v2260_v5 }
 0x829   :  { %1993 = vmatprep.subr.bf16.mxu1 %v2260_v5 }
 0x82c   :  { %1994 = vmatpush3.bf16.msra.mxu1 %v2356_v7 }
 0x82d   :  { %2007 = vmatprep.subr.bf16.mxu1 %v2260_v5 }
 0x8e7   :  { %v463_v31 = vpop.f32.mrf.mxu1 }
 0x8e8   :  { %v469_v32 = vadd.f32 %v463_v31, %v2385_v19 }
 0x8e9   :  { %v1981_v33 = vpop.f32.mrf.mxu1 }
 0x8ea   :  { %2156 = vtanh.f32 %v469_v32  ;;  %v1797_v37 = vmul.f32 -1.442695, %v469_v32 }
 0x8eb   :  { %v466_v34 = vpop.f32.mrf.mxu1 }
 0x8ec   :  { %2158 = vpow2.f32 %v1797_v37 }
 0x8ed   :  { %v1982_v35 = vpop.f32.mrf.mxu1 }
 0x8f7   :  { %v2157_v36 = vpop.eup %2156 }
 0x8f8   :  { %479 = vrot.lane.b32.xlu0 %v2157_v36, %s2263_s3 }
 0x8f9   :  { %v2159_v38 = vpop.eup %2158 }
 0x8fa   :  { %v473_v39 = vadd.f32 1.0, %v2159_v38 }
 0x8fc   :  { %2160 = vrcp.f32 %v473_v39 }
 0x909   :  { %v2161_v40 = vpop.eup %2160 }
 0x90a   :  { %v477_v44 = vmul.f32 %v2161_v40, %v406_v12 }
 0x96a   :  { %v480_v41 = vpop.permute.xlu0 %479 }
 0x96b   :  { %v482_v43 = vmul.f32 %v2161_v40, %v480_v41 }
 0x96d   :  { %484 = vrot.lane.b32.xlu1 %v482_v43, %s2264_s30 }
 0x9df   :  { %v485_v45 = vpop.permute.xlu1 %484 }
 0x9e0   :  { %v487_v19 = vadd.f32 %v485_v45, %v477_v44 }
 0x9e2   :  { %2162 = vtanh.f32 %v487_v19 }
 0x9ef   :  { %v2163_v46 = vpop.eup %2162 }
 0x9f0   :  { %490 = vrot.lane.b32.xlu0 %v2163_v46, %s2263_s3 }
 0xa62   :  { %v491_v47 = vpop.permute.xlu0 %490 }
 0xa63   :  { %v493_v48 = vmul.f32 %v2161_v40, %v491_v47 }
 0xa65   :  { %v2438_v49 = vpack.c.bf16 %v493_v48, %v493_v48 }
 0xa67   :  { %505 = vrot.lane.b32.xlu1 %v2438_v49, %s2264_s30 }
 0xad9   :  { %v506_v50 = vpop.permute.xlu1 %505 }
 0xada   :  { %1988 = vmatmul.mubr.msk.bf16.vlgmr.msra.gmra.mxu0 %vm182_vm2, %v506_v50 }
 0xadb   :  { %2000 = vmatpush3.bf16.msra.mxu0 %v2347_v6  ;;  %2003 = vmatprep.mubr.msk.bf16.mxu0 %vm2261_vm1, %v2260_v5 }
 0xadc   :  { %2001 = vmatprep.subr.bf16.mxu0 %v2260_v5 }
 0xadf   :  { %2002 = vmatpush3.bf16.msra.mxu0 %v2356_v7 }
 0xb9a   :  { %v544_v51 = vpop.f32.mrf.mxu0 }
 0xb9b   :  { %v550_v52 = vadd.f32 %v544_v51, %v2383_v16 }
 0xb9c   :  { %v1989_v53 = vpop.f32.mrf.mxu0 }
 0xb9d   :  { %2164 = vtanh.f32 %v550_v52  ;;  %v1800_v57 = vmul.f32 -1.442695, %v550_v52 }
 0xb9e   :  { %v547_v54 = vpop.f32.mrf.mxu0 }
 0xb9f   :  { %2166 = vpow2.f32 %v1800_v57 }
 0xba0   :  { %v1990_v55 = vpop.f32.mrf.mxu0 }
 0xbaa   :  { %v2165_v56 = vpop.eup %2164 }
 0xbab   :  { %560 = vrot.lane.b32.xlu0 %v2165_v56, %s2263_s3 }
 0xbac   :  { %v2167_v58 = vpop.eup %2166 }
 0xbad   :  { %v554_v59 = vadd.f32 1.0, %v2167_v58  ;;  %v2514_v58 = vld [vmem:[%s2758_s5] sm:$0xff]  }
 0xbaf   :  { %2168 = vrcp.f32 %v554_v59 }
 0xbbc   :  { %v2169_v60 = vpop.eup %2168 }
 0xbbd   :  { %v558_v63 = vmul.f32 %v2169_v60, %v487_v19 }
 0xc1d   :  { %v561_v61 = vpop.permute.xlu0 %560 }
 0xc1e   :  { %v563_v62 = vmul.f32 %v2169_v60, %v561_v61 }
 0xc20   :  { %565 = vrot.lane.b32.xlu1 %v563_v62, %s2264_s30 }
 0xc92   :  { %v566_v1 = vpop.permute.xlu1 %565 }
 0xc93   :  { %v568_v16 = vadd.f32 %v566_v1, %v558_v63 }
 0xc95   :  { %2170 = vtanh.f32 %v568_v16 }
 0xca2   :  { %v2171_v2 = vpop.eup %2170 }
 0xca3   :  { %571 = vrot.lane.b32.xlu0 %v2171_v2, %s2263_s3 }
 0xd15   :  { %v572_v3 = vpop.permute.xlu0 %571 }
 0xd16   :  { %v574_v4 = vmul.f32 %v2169_v60, %v572_v3 }
 0xd18   :  { %v2452_v9 = vpack.c.bf16 %v574_v4, %v574_v4 }
 0xd1a   :  { %586 = vrot.lane.b32.xlu1 %v2452_v9, %s2264_s30 }
 0xd8c   :  { %v587_v10 = vpop.permute.xlu1 %586 }
 0xd8d   :  { %1996 = vmatmul.mubr.msk.bf16.vlgmr.msra.gmra.mxu1 %vm182_vm2, %v587_v10 }
 0xd8e   :  { %2008 = vmatpush3.bf16.msra.mxu1 %v2347_v6  ;;  %2011 = vmatprep.mubr.msk.bf16.mxu1 %vm2261_vm1, %v2260_v5 }
 0xd8f   :  { %2009 = vmatprep.subr.bf16.mxu1 %v2260_v5 }
 0xd92   :  { %2010 = vmatpush3.bf16.msra.mxu1 %v2356_v7 }
 0xd93   :  { %2027 = vmatprep.subr.bf16.mxu1 %v2260_v5 }
 0xe4d   :  { %v625_v11 = vpop.f32.mrf.mxu1 }
 0xe4e   :  { %v631_v14 = vadd.f32 %v625_v11, %v2389_v23 }
 0xe4f   :  { %v1997_v15 = vpop.f32.mrf.mxu1 }
 0xe50   :  { %2172 = vtanh.f32 %v631_v14  ;;  %v1803_v6 = vmul.f32 -1.442695, %v631_v14 }
 0xe51   :  { %v628_v17 = vpop.f32.mrf.mxu1 }
 0xe52   :  { %2174 = vpow2.f32 %v1803_v6 }
 0xe53   :  { %v1998_v18 = vpop.f32.mrf.mxu1 }
 0xe5d   :  { %v2173_v21 = vpop.eup %2172 }
 0xe5e   :  { %641 = vrot.lane.b32.xlu0 %v2173_v21, %s2263_s3 }
 0xe5f   :  { %v2175_v22 = vpop.eup %2174 }
 0xe60   :  { %v635_v24 = vadd.f32 1.0, %v2175_v22 }
 0xe62   :  { %2176 = vrcp.f32 %v635_v24 }
 0xe6f   :  { %v2177_v25 = vpop.eup %2176 }
 0xe70   :  { %v639_v26 = vmul.f32 %v2177_v25, %v568_v16 }
 0xed0   :  { %v642_v12 = vpop.permute.xlu0 %641 }
 0xed1   :  { %v644_v7 = vmul.f32 %v2177_v25, %v642_v12 }
 0xed3   :  { %646 = vrot.lane.b32.xlu1 %v644_v7, %s2264_s30 }
 0xf45   :  { %v647_v27 = vpop.permute.xlu1 %646 }
 0xf46   :  { %v649_v23 = vadd.f32 %v647_v27, %v639_v26 }
 0xf48   :  { %2178 = vtanh.f32 %v649_v23 }
 0xf55   :  { %v2179_v28 = vpop.eup %2178 }
 0xf56   :  { %652 = vrot.lane.b32.xlu0 %v2179_v28, %s2263_s3 }
 0xfc8   :  { %v653_v30 = vpop.permute.xlu0 %652 }
 0xfc9   :  { %v655_v31 = vmul.f32 %v2177_v25, %v653_v30 }
 0xfcb   :  { %v2467_v32 = vpack.c.bf16 %v655_v31, %v655_v31 }
 0xfcd   :  { %667 = vrot.lane.b32.xlu1 %v2467_v32, %s2264_s30 }
0x103f   :  { %v668_v33 = vpop.permute.xlu1 %667 }
0x1040   :  { %2004 = vmatmul.mubr.msk.bf16.vlgmr.msra.gmra.mxu0 %vm182_vm2, %v668_v33 }
0x1100   :  { %v706_v34 = vpop.f32.mrf.mxu0 }
0x1101   :  { %v712_v35 = vadd.f32 %v706_v34, %v2381_v13 }
0x1102   :  { %v2005_v36 = vpop.f32.mrf.mxu0 }
0x1103   :  { %2180 = vtanh.f32 %v712_v35  ;;  %v1806_v40 = vmul.f32 -1.442695, %v712_v35 }
0x1104   :  { %v709_v37 = vpop.f32.mrf.mxu0 }
0x1105   :  { %2182 = vpow2.f32 %v1806_v40 }
0x1106   :  { %v2006_v38 = vpop.f32.mrf.mxu0 }
0x1110   :  { %v2181_v39 = vpop.eup %2180 }
0x1111   :  { %722 = vrot.lane.b32.xlu0 %v2181_v39, %s2263_s3 }
0x1112   :  { %v2183_v41 = vpop.eup %2182 }
0x1113   :  { %v716_v43 = vadd.f32 1.0, %v2183_v41 }
0x1115   :  { %2184 = vrcp.f32 %v716_v43 }
0x1122   :  { %v2185_v44 = vpop.eup %2184 }
0x1123   :  { %v720_v13 = vmul.f32 %v2185_v44, %v649_v23 }
0x1183   :  { %v723_v45 = vpop.permute.xlu0 %722 }
0x1184   :  { %v725_v19 = vmul.f32 %v2185_v44, %v723_v45 }
0x1186   :  { %727 = vrot.lane.b32.xlu1 %v725_v19, %s2264_s30 }
0x118a   :  { %255 = vrot.lane.b32.xlu1 %v2394_v42, %s2264_s30  ;;  %v2118_v42 = vld [vmem:[%s2757_s4 + $0x8] sm:$0xff]  }
0x118b   :  { %2015 = vmatprep.subr.bf16.mxu0 %v2118_v42 }
0x118c   :  { %2016 = vmatpush3.bf16.msra.mxu0 %v2118_v42 }
0x118e   :  { %417 = vrot.lane.b32.xlu1 %v2423_v29, %s2264_s30  ;;  %v2119_v29 = vld [vmem:[%s2757_s4] sm:$0xff]  }
0x118f   :  { %2017 = vmatprep.subr.bf16.mxu0 %v2119_v29 }
0x1190   :  { %2018 = vmatpush3.bf16.msra.mxu0 %v2119_v29 }
0x1191   :  { %2043 = vmatprep.subr.bf16.mxu0 %v2260_v5 }
0x11f8   :  { %v728_v46 = vpop.permute.xlu1 %727 }
0x11f9   :  { %v2479_v47 = vadd.f32 %v728_v46, %v720_v13 }
0x11fb   :  { %2186 = vtanh.f32 %v2479_v47 }
0x11fc   :  { %v256_v48 = vpop.permute.xlu1 %255 }
0x11fd   :  { %259 = vst.msk [vmem:[#allocation3] sm:$0xf] %vm258_vm3, %v256_v48 }
0x1200   :  { %v418_v50 = vpop.permute.xlu1 %417 }
0x1201   :  { %421 = vst.msk [vmem:[#allocation3 + $0x8] sm:$0xf] %vm258_vm3, %v418_v50 }
0x1208   :  { %v2187_v51 = vpop.eup %2186 }
0x1209   :  { %733 = vrot.lane.b32.xlu0 %v2187_v51, %s2263_s3 }
0x120d   :  { %336 = vrot.lane.b32.xlu0 %v2408_v0, %s2264_s30 }
0x1211   :  { %498 = vrot.lane.b32.xlu0 %v2438_v49, %s2264_s30  ;;  %v2506_v49 = vld [vmem:[%s2758_s5 + $0x8] sm:$0xff]  }
0x127b   :  { %v734_v52 = vpop.permute.xlu0 %733 }
0x127c   :  { %v736_v53 = vmul.f32 %v2185_v44, %v734_v52 }
0x127e   :  { %v2496_v54 = vpack.c.bf16 %v736_v53, %v736_v53 }
0x127f   :  { %v337_v55 = vpop.permute.xlu0 %336 }
0x1280   :  { %340 = vst.msk [vmem:[#allocation3 + $0x4] sm:$0xf] %vm258_vm3, %v337_v55  ;;  %748 = vrot.lane.b32.xlu1 %v2496_v54, %s2264_s30 }
0x1283   :  { %v499_v56 = vpop.permute.xlu0 %498 }
0x1284   :  { %502 = vst.msk [vmem:[#allocation3 + $0xc] sm:$0xf] %vm258_vm3, %v499_v56 }
0x1287   :  { %v2120_v57 = vld [vmem:[#allocation3] sm:$0xff]  }
0x1288   :  { %2019 = vmatprep.mubr.msk.bf16.mxu0 %vm182_vm2, %v2120_v57 }
0x128b   :  { %v2121_v0 = vld [vmem:[#allocation3 + $0x8] sm:$0xff]  }
0x128c   :  { %2020 = vmatmul.mubr.msk.bf16.vlgmr.msra.gmra.mxu0 %vm182_vm2, %v2121_v0 }
0x128d   :  { %2044 = vmatpush3.bf16.msra.mxu0 %v2506_v49 }
0x128e   :  { %2045 = vmatprep.subr.bf16.mxu0 %v2260_v5 }
0x1291   :  { %2046 = vmatpush3.bf16.msra.mxu0 %v2514_v58 }
0x1292   :  { %2059 = vmatprep.subr.bf16.mxu0 %v2260_v5 }
0x12f2   :  { %v749_v59 = vpop.permute.xlu1 %748 }
0x12f3   :  { %2012 = vmatmul.mubr.msk.bf16.vlgmr.msra.gmra.mxu1 %vm182_vm2, %v749_v59 }
0x12f4   :  { %2028 = vmatpush3.bf16.msra.mxu1 %v2506_v49  ;;  %2031 = vmatprep.mubr.msk.bf16.mxu1 %vm2261_vm1, %v2260_v5 }
0x12f5   :  { %2029 = vmatprep.subr.bf16.mxu1 %v2260_v5 }
0x12f8   :  { %2030 = vmatpush3.bf16.msra.mxu1 %v2514_v58 }
0x12f9   :  { %2035 = vmatprep.subr.bf16.mxu1 %v2260_v5 }
0x12fb   :  { %2032 = vmatmul.mubr.bf16.vlgmr.msra.gmra.mxu1 %v2262_v8  ;;  %v2538_v8 = vld [vmem:[%s2759_s6] ss:$0 sm:$0xff] }
0x12fc   :  { %2036 = vmatpush3.bf16.msra.mxu1 %v2506_v49  ;;  %2039 = vmatprep.mubr.msk.bf16.mxu1 %vm2261_vm1, %v2260_v5 }
0x12fd   :  { %2037 = vmatprep.subr.bf16.mxu1 %v2260_v5 }
0x1300   :  { %2038 = vmatpush3.bf16.msra.mxu1 %v2514_v58 }
0x1301   :  { %2051 = vmatprep.subr.bf16.mxu1 %v2260_v5 }
0x134c   :  { %v2532_v60 = vpop.f32.mrf.mxu0 }
0x134e   :  { %v934_v1 = vpop.f32.mrf.mxu0 }
0x134f   :  { %v935_v3 = vadd.f32 %v2538_v8, %v934_v1 }
0x1350   :  { %v2568_v13 = vpop.f32.mrf.mxu0 }
0x1352   :  { %v937_v46 = vpop.f32.mrf.mxu0 }
0x13b3   :  { %v787_v61 = vpop.f32.mrf.mxu1 }
0x13b4   :  { %v793_v62 = vadd.f32 %v787_v61, %v2387_v20 }
0x13b5   :  { %v2013_v63 = vpop.f32.mrf.mxu1 }
0x13b6   :  { %v1809_v23 = vmul.f32 -1.442695, %v793_v62 }
0x13b7   :  { %v790_v16 = vpop.f32.mrf.mxu1 }
0x13b9   :  { %v2014_v2 = vpop.f32.mrf.mxu1 }
0x13bb   :  { %v1024_v4 = vpop.f32.mrf.mxu1 }
0x13bc   :  { %v1030_v10 = vadd.f32 %v1024_v4, %v935_v3 }
0x13bd   :  { %v2033_v11 = vpop.f32.mrf.mxu1 }
0x13be   :  { %2188 = vtanh.f32 %v1030_v10  ;;  %v1824_v20 = vmul.f32 -1.442695, %v1030_v10 }
0x13bf   :  { %v1027_v14 = vpop.f32.mrf.mxu1 }
0x13c0   :  { %2190 = vpow2.f32 %v1824_v20 }
0x13c1   :  { %v2034_v15 = vpop.f32.mrf.mxu1 }
0x13cb   :  { %v2189_v17 = vpop.eup %2188 }
0x13cc   :  { %1040 = vrot.lane.b32.xlu0 %v2189_v17, %s2263_s3 }
0x13cd   :  { %v2191_v18 = vpop.eup %2190 }
0x13ce   :  { %v1034_v21 = vadd.f32 1.0, %v2191_v18 }
0x13d0   :  { %2192 = vrcp.f32 %v1034_v21  ;;  %v943_v21 = vadd.f32 %v2532_v60, %v2538_v8 }
0x13dd   :  { %v2193_v6 = vpop.eup %2192 }
0x13de   :  { %v1038_v25 = vmul.f32 0.0, %v2193_v6 }
0x143e   :  { %v1041_v22 = vpop.permute.xlu0 %1040 }
0x143f   :  { %v1043_v24 = vmul.f32 %v2193_v6, %v1041_v22 }
0x1441   :  { %1045 = vrot.lane.b32.xlu1 %v1043_v24, %s2264_s30 }
0x14b3   :  { %v1046_v12 = vpop.permute.xlu1 %1045 }
0x14b4   :  { %v1048_v7 = vadd.f32 %v1046_v12, %v1038_v25 }
0x14b6   :  { %2194 = vtanh.f32 %v1048_v7 }
0x14b7   :  { %2196 = vtanh.f32 %v793_v62 }
0x14b8   :  { %2198 = vpow2.f32 %v1809_v23 }
0x14c3   :  { %v2195_v26 = vpop.eup %2194 }
0x14c4   :  { %1051 = vrot.lane.b32.xlu0 %v2195_v26, %s2263_s3  ;;  %v2197_v27 = vpop.eup %2196 }
0x14c5   :  { %v2199_v28 = vpop.eup %2198 }
0x14c6   :  { %v797_v30 = vadd.f32 1.0, %v2199_v28 }
0x14c8   :  { %803 = vrot.lane.b32.xlu0 %v2197_v27, %s2263_s3  ;;  %2200 = vrcp.f32 %v797_v30 }
0x14d5   :  { %v2201_v35 = vpop.eup %2200 }
0x14d6   :  { %v801_v39 = vmul.f32 %v2201_v35, %v2479_v47  ;;  %v938_v47 = vadd.f32 %v2538_v8, %v937_v46 }
0x1536   :  { %v1052_v31 = vpop.permute.xlu0 %1051 }
0x1537   :  { %v1054_v33 = vmul.f32 %v2193_v6, %v1052_v31 }
0x1539   :  { %v2545_v34 = vpack.c.bf16 %v1054_v33, %v1054_v33 }
0x153a   :  { %v804_v36 = vpop.permute.xlu0 %803 }
0x153b   :  { %v806_v37 = vmul.f32 %v2201_v35, %v804_v36  ;;  %1064 = vrot.lane.b32.xlu1 %v2545_v34, %s2264_s30 }
0x153d   :  { %808 = vrot.lane.b32.xlu0 %v806_v37, %s2264_s30 }
0x15ad   :  { %v1065_v38 = vpop.permute.xlu1 %1064 }
0x15ae   :  { %2040 = vmatmul.mubr.msk.bf16.vlgmr.msra.gmra.mxu1 %vm182_vm2, %v1065_v38 }
0x15af   :  { %v809_v40 = vpop.permute.xlu0 %808  ;;  %2052 = vmatpush3.bf16.msra.mxu1 %v2506_v49  ;;  %2055 = vmatprep.mubr.msk.bf16.mxu1 %vm2261_vm1, %v2260_v5 }
0x15b0   :  { %v2555_v41 = vadd.f32 %v809_v40, %v801_v39  ;;  %2053 = vmatprep.subr.bf16.mxu1 %v2260_v5 }
0x15b2   :  { %2202 = vtanh.f32 %v2555_v41 }
0x15b3   :  { %2054 = vmatpush3.bf16.msra.mxu1 %v2514_v58 }
0x15b4   :  { %2067 = vmatprep.subr.bf16.mxu1 %v2260_v5 }
0x15bf   :  { %v2203_v43 = vpop.eup %2202 }
0x15c0   :  { %814 = vrot.lane.b32.xlu0 %v2203_v43, %s2263_s3  ;;  %v946_v43 = vadd.f32 %v2568_v13, %v2538_v8 }
0x15c4   :  { %579 = vrot.lane.b32.xlu0 %v2452_v9, %s2264_s30 }
0x15c8   :  { %741 = vrot.lane.b32.xlu0 %v2496_v54, %s2264_s30 }
0x1632   :  { %v815_v44 = vpop.permute.xlu0 %814 }
0x1633   :  { %v2574_v63 = vmul.f32 %v2201_v35, %v815_v44 }
0x1635   :  { %v1867_v1 = vpack.c.bf16 %v2574_v63, %v2574_v63 }
0x1636   :  { %v580_v45 = vpop.permute.xlu0 %579 }
0x1637   :  { %583 = vst.msk [vmem:[#allocation3 + $0x10] sm:$0xf] %vm258_vm3, %v580_v45 }
0x163a   :  { %v742_v19 = vpop.permute.xlu0 %741 }
0x163b   :  { %745 = vst.msk [vmem:[#allocation3 + $0x18] sm:$0xf] %vm258_vm3, %v742_v19 }
0x166e   :  { %v1103_v48 = vpop.f32.mrf.mxu1 }
0x166f   :  { %v1109_v50 = vadd.f32 %v1103_v48, %v938_v47 }
0x1670   :  { %v2041_v42 = vpop.f32.mrf.mxu1 }
0x1671   :  { %2204 = vtanh.f32 %v1109_v50  ;;  %v1827_v52 = vmul.f32 -1.442695, %v1109_v50 }
0x1672   :  { %v1106_v9 = vpop.f32.mrf.mxu1 }
0x1673   :  { %2206 = vpow2.f32 %v1827_v52 }
0x1674   :  { %v2042_v29 = vpop.f32.mrf.mxu1 }
0x167e   :  { %v2205_v51 = vpop.eup %2204 }
0x167f   :  { %1119 = vrot.lane.b32.xlu1 %v2205_v51, %s2263_s3 }
0x1680   :  { %v2207_v53 = vpop.eup %2206 }
0x1681   :  { %v1113_v54 = vadd.f32 1.0, %v2207_v53 }
0x1683   :  { %2208 = vrcp.f32 %v1113_v54 }
0x1690   :  { %v2209_v55 = vpop.eup %2208 }
0x1691   :  { %v1117_v0 = vmul.f32 %v2209_v55, %v1048_v7 }
0x16f1   :  { %v1120_v56 = vpop.permute.xlu1 %1119 }
0x16f2   :  { %v1122_v57 = vmul.f32 %v2209_v55, %v1120_v56 }
0x16f4   :  { %1124 = vrot.lane.b32.xlu1 %v1122_v57, %s2264_s30 }
0x1766   :  { %v1125_v59 = vpop.permute.xlu1 %1124 }
0x1767   :  { %v1127_v61 = vadd.f32 %v1125_v59, %v1117_v0 }
0x1769   :  { %2210 = vtanh.f32 %v1127_v61 }
0x1776   :  { %v2211_v62 = vpop.eup %2210 }
0x1777   :  { %1130 = vrot.lane.b32.xlu1 %v2211_v62, %s2263_s3 }
0x177b   :  { %660 = vrot.lane.b32.xlu1 %v2467_v32, %s2264_s30 }
0x177f   :  { %822 = vrot.lane.b32.xlu1 %v1867_v1, %s2264_s30 }
0x17e9   :  { %v1131_v16 = vpop.permute.xlu1 %1130 }
0x17ea   :  { %v1133_v2 = vmul.f32 %v2209_v55, %v1131_v16 }
0x17ec   :  { %v2581_v3 = vpack.c.bf16 %v1133_v2, %v1133_v2 }
0x17ed   :  { %v661_v4 = vpop.permute.xlu1 %660 }
0x17ee   :  { %664 = vst.msk [vmem:[#allocation3 + $0x14] sm:$0xf] %vm258_vm3, %v661_v4  ;;  %1143 = vrot.lane.b32.xlu0 %v2581_v3, %s2264_s30 }
0x17f1   :  { %v823_v10 = vpop.permute.xlu1 %822 }
0x17f2   :  { %826 = vst.msk [vmem:[#allocation3 + $0x1c] sm:$0xf] %vm258_vm3, %v823_v10 }
0x17f5   :  { %v2124_v11 = vld [vmem:[#allocation3 + $0x10] sm:$0xff]  }
0x17f6   :  { %2023 = vmatprep.mubr.msk.bf16.mxu0 %vm182_vm2, %v2124_v11 }
0x17f9   :  { %v2125_v32 = vld [vmem:[#allocation3 + $0x18] sm:$0xff]  }
0x17fa   :  { %2024 = vmatmul.mubr.msk.bf16.gmra.mxu0 %vm182_vm2, %v2125_v32 }
0x17fb   :  { %2047 = vmatprep.mubr.msk.bf16.mxu0 %vm2261_vm1, %v2260_v5 }
0x1860   :  { %v1144_v14 = vpop.permute.xlu0 %1143 }
0x1861   :  { %2048 = vmatmul.mubr.msk.bf16.vlgmr.msra.gmra.mxu0 %vm182_vm2, %v1144_v14 }
0x1862   :  { %2060 = vmatpush3.bf16.msra.mxu0 %v2506_v49  ;;  %2063 = vmatprep.mubr.msk.bf16.mxu0 %vm2261_vm1, %v2260_v5 }
0x1863   :  { %2061 = vmatprep.subr.bf16.mxu0 %v2260_v5 }
0x1866   :  { %2062 = vmatpush3.bf16.msra.mxu0 %v2514_v58 }
0x1867   :  { %2075 = vmatprep.subr.bf16.mxu0 %v2260_v5 }
0x18ba   :  { %v2598_v15 = vpop.f32.mrf.mxu0 }
0x18bc   :  { %v2600_v17 = vpop.f32.mrf.mxu0 }
0x18be   :  { %v2602_v20 = vpop.f32.mrf.mxu0 }
0x18c0   :  { %v2604_v18 = vpop.f32.mrf.mxu0 }
0x1921   :  { %v1182_v6 = vpop.f32.mrf.mxu0 }
0x1922   :  { %v1188_v22 = vadd.f32 %v1182_v6, %v943_v21 }
0x1923   :  { %v2049_v24 = vpop.f32.mrf.mxu0 }
0x1924   :  { %2212 = vtanh.f32 %v1188_v22  ;;  %v1830_v26 = vmul.f32 -1.442695, %v1188_v22 }
0x1925   :  { %v1185_v25 = vpop.f32.mrf.mxu0 }
0x1926   :  { %2214 = vpow2.f32 %v1830_v26 }
0x1927   :  { %v2050_v12 = vpop.f32.mrf.mxu0 }
0x1931   :  { %v2213_v7 = vpop.eup %2212 }
0x1932   :  { %1198 = vrot.lane.b32.xlu1 %v2213_v7, %s2263_s3 }
0x1933   :  { %v2215_v27 = vpop.eup %2214 }
0x1934   :  { %v1192_v23 = vadd.f32 1.0, %v2215_v27 }
0x1936   :  { %2216 = vrcp.f32 %v1192_v23 }
0x1943   :  { %v2217_v28 = vpop.eup %2216 }
0x1944   :  { %v1196_v60 = vmul.f32 %v2217_v28, %v1127_v61  ;;  %v951_v61 = vadd.f32 %v2538_v8, %v2600_v17 }
0x19a4   :  { %v1199_v30 = vpop.permute.xlu1 %1198 }
0x19a5   :  { %v1201_v31 = vmul.f32 %v2217_v28, %v1199_v30 }
0x19a7   :  { %1203 = vrot.lane.b32.xlu0 %v1201_v31, %s2264_s30 }
0x1a19   :  { %v1204_v33 = vpop.permute.xlu0 %1203 }
0x1a1a   :  { %v1206_v35 = vadd.f32 %v1204_v33, %v1196_v60 }
0x1a1c   :  { %2218 = vtanh.f32 %v1206_v35 }
0x1a29   :  { %v2219_v36 = vpop.eup %2218 }
0x1a2a   :  { %1209 = vrot.lane.b32.xlu1 %v2219_v36, %s2263_s3 }
0x1a9c   :  { %v1210_v37 = vpop.permute.xlu1 %1209 }
0x1a9d   :  { %v1212_v38 = vmul.f32 %v2217_v28, %v1210_v37  ;;  %v954_v28 = vadd.f32 %v2538_v8, %v2604_v18 }
0x1a9f   :  { %v2611_v39 = vpack.c.bf16 %v1212_v38, %v1212_v38 }
0x1aa1   :  { %1222 = vrot.lane.b32.xlu0 %v2611_v39, %s2264_s30 }
0x1b13   :  { %v1223_v40 = vpop.permute.xlu0 %1222 }
0x1b14   :  { %2056 = vmatmul.mubr.msk.bf16.vlgmr.msra.gmra.mxu1 %vm182_vm2, %v1223_v40 }
0x1b15   :  { %2068 = vmatpush3.bf16.msra.mxu1 %v2506_v49  ;;  %2071 = vmatprep.mubr.msk.bf16.mxu1 %vm2261_vm1, %v2260_v5 }
0x1b16   :  { %2069 = vmatprep.subr.bf16.mxu1 %v2260_v5 }
0x1b19   :  { %2070 = vmatpush3.bf16.msra.mxu1 %v2514_v58 }
0x1b1a   :  { %2083 = vmatprep.subr.bf16.mxu1 %v2260_v5 }
0x1bd4   :  { %v1261_v44 = vpop.f32.mrf.mxu1 }
0x1bd5   :  { %v1267_v45 = vadd.f32 %v1261_v44, %v946_v43 }
0x1bd6   :  { %v2057_v19 = vpop.f32.mrf.mxu1 }
0x1bd7   :  { %2220 = vtanh.f32 %v1267_v45  ;;  %v1833_v50 = vmul.f32 -1.442695, %v1267_v45 }
0x1bd8   :  { %v1264_v46 = vpop.f32.mrf.mxu1 }
0x1bd9   :  { %2222 = vpow2.f32 %v1833_v50  ;;  %v959_v50 = vadd.f32 %v2598_v15, %v2538_v8 }
0x1bda   :  { %v2058_v47 = vpop.f32.mrf.mxu1 }
0x1be4   :  { %v2221_v48 = vpop.eup %2220 }
0x1be5   :  { %1277 = vrot.lane.b32.xlu1 %v2221_v48, %s2263_s3 }
0x1be6   :  { %v2223_v42 = vpop.eup %2222 }
0x1be7   :  { %v1271_v9 = vadd.f32 1.0, %v2223_v42 }
0x1be9   :  { %2224 = vrcp.f32 %v1271_v9 }
0x1bf6   :  { %v2225_v29 = vpop.eup %2224 }
0x1bf7   :  { %v1275_v13 = vmul.f32 %v2225_v29, %v1206_v35 }
0x1c57   :  { %v1278_v51 = vpop.permute.xlu1 %1277 }
0x1c58   :  { %v1280_v52 = vmul.f32 %v2225_v29, %v1278_v51 }
0x1c5a   :  { %1282 = vrot.lane.b32.xlu0 %v1280_v52, %s2264_s30 }
0x1ccc   :  { %v1283_v53 = vpop.permute.xlu0 %1282 }
0x1ccd   :  { %v1285_v54 = vadd.f32 %v1283_v53, %v1275_v13 }
0x1ccf   :  { %2226 = vtanh.f32 %v1285_v54 }
0x1cdc   :  { %v2227_v55 = vpop.eup %2226 }
0x1cdd   :  { %1288 = vrot.lane.b32.xlu1 %v2227_v55, %s2263_s3 }
0x1d4f   :  { %v1289_v56 = vpop.permute.xlu1 %1288 }
0x1d50   :  { %v1291_v57 = vmul.f32 %v2225_v29, %v1289_v56 }
0x1d52   :  { %v2627_v0 = vpack.c.bf16 %v1291_v57, %v1291_v57 }
0x1d54   :  { %1301 = vrot.lane.b32.xlu0 %v2627_v0, %s2264_s30 }
0x1dc6   :  { %v1302_v59 = vpop.permute.xlu0 %1301 }
0x1dc7   :  { %2064 = vmatmul.mubr.msk.bf16.vlgmr.msra.gmra.mxu0 %vm182_vm2, %v1302_v59 }
0x1dc8   :  { %2076 = vmatpush3.bf16.msra.mxu0 %v2506_v49  ;;  %2079 = vmatprep.mubr.msk.bf16.mxu0 %vm2261_vm1, %v2260_v5 }
0x1dc9   :  { %2077 = vmatprep.subr.bf16.mxu0 %v2260_v5 }
0x1dcc   :  { %2078 = vmatpush3.bf16.msra.mxu0 %v2514_v58 }
0x1e87   :  { %v1340_v62 = vpop.f32.mrf.mxu0 }
0x1e88   :  { %v1346_v1 = vadd.f32 %v1340_v62, %v951_v61 }
0x1e89   :  { %v2065_v16 = vpop.f32.mrf.mxu0 }
0x1e8a   :  { %2228 = vtanh.f32 %v1346_v1  ;;  %v1836_v11 = vmul.f32 -1.442695, %v1346_v1 }
0x1e8b   :  { %v1343_v2 = vpop.f32.mrf.mxu0 }
0x1e8c   :  { %2230 = vpow2.f32 %v1836_v11  ;;  %v962_v11 = vadd.f32 %v2602_v20, %v2538_v8 }
0x1e8d   :  { %v2066_v4 = vpop.f32.mrf.mxu0 }
0x1e97   :  { %v2229_v10 = vpop.eup %2228 }
0x1e98   :  { %1356 = vrot.lane.b32.xlu1 %v2229_v10, %s2263_s3 }
0x1e99   :  { %v2231_v32 = vpop.eup %2230 }
0x1e9a   :  { %v1350_v14 = vadd.f32 1.0, %v2231_v32 }
0x1e9c   :  { %2232 = vrcp.f32 %v1350_v14 }
0x1ea9   :  { %v2233_v21 = vpop.eup %2232 }
0x1eaa   :  { %v1354_v17 = vmul.f32 %v2233_v21, %v1285_v54 }
0x1f0a   :  { %v1357_v6 = vpop.permute.xlu1 %1356 }
0x1f0b   :  { %v1359_v22 = vmul.f32 %v2233_v21, %v1357_v6 }
0x1f0d   :  { %1361 = vrot.lane.b32.xlu0 %v1359_v22, %s2264_s30 }
0x1f7f   :  { %v1362_v24 = vpop.permute.xlu0 %1361 }
0x1f80   :  { %v1364_v25 = vadd.f32 %v1362_v24, %v1354_v17 }
0x1f82   :  { %2234 = vtanh.f32 %v1364_v25 }
0x1f8f   :  { %v2235_v12 = vpop.eup %2234 }
0x1f90   :  { %1367 = vrot.lane.b32.xlu1 %v2235_v12, %s2263_s3 }
0x2002   :  { %v1368_v7 = vpop.permute.xlu1 %1367 }
0x2003   :  { %v1370_v26 = vmul.f32 %v2233_v21, %v1368_v7 }
0x2005   :  { %v2642_v27 = vpack.c.bf16 %v1370_v26, %v1370_v26 }
0x2007   :  { %1380 = vrot.lane.b32.xlu0 %v2642_v27, %s2264_s30 }
0x2079   :  { %v1381_v23 = vpop.permute.xlu0 %1380 }
0x207a   :  { %2072 = vmatmul.mubr.msk.bf16.vlgmr.msra.gmra.mxu1 %vm182_vm2, %v1381_v23 }
0x207b   :  { %2084 = vmatpush3.bf16.msra.mxu1 %v2506_v49  ;;  %2087 = vmatprep.mubr.msk.bf16.mxu1 %vm2261_vm1, %v2260_v5 }
0x207c   :  { %2085 = vmatprep.subr.bf16.mxu1 %v2260_v5 }
0x207f   :  { %2086 = vmatpush3.bf16.msra.mxu1 %v2514_v58 }
0x213a   :  { %v1419_v30 = vpop.f32.mrf.mxu1 }
0x213b   :  { %v1425_v31 = vadd.f32 %v1419_v30, %v954_v28 }
0x213c   :  { %v2073_v60 = vpop.f32.mrf.mxu1 }
0x213d   :  { %2236 = vtanh.f32 %v1425_v31  ;;  %v1839_v49 = vmul.f32 -1.442695, %v1425_v31  ;;  %v2127_v60 = vld [vmem:[%s2760_s7] sm:$0xff]  }
0x213e   :  { %v1422_v33 = vpop.f32.mrf.mxu1 }
0x213f   :  { %2238 = vpow2.f32 %v1839_v49 }
0x2140   :  { %v2074_v35 = vpop.f32.mrf.mxu1 }
0x214a   :  { %v2237_v36 = vpop.eup %2236 }
0x214b   :  { %1435 = vrot.lane.b32.xlu1 %v2237_v36, %s2263_s3 }
0x214c   :  { %v2239_v37 = vpop.eup %2238 }
0x214d   :  { %v1429_v38 = vadd.f32 1.0, %v2239_v37 }
0x214f   :  { %2240 = vrcp.f32 %v1429_v38 }
0x215c   :  { %v2241_v5 = vpop.eup %2240 }
0x215d   :  { %v1433_v18 = vmul.f32 %v2241_v5, %v1364_v25 }
0x21bd   :  { %v1436_v40 = vpop.permute.xlu1 %1435 }
0x21be   :  { %v1438_v58 = vmul.f32 %v2241_v5, %v1436_v40 }
0x21c0   :  { %1440 = vrot.lane.b32.xlu0 %v1438_v58, %s2264_s30 }
0x2232   :  { %v1441_v43 = vpop.permute.xlu0 %1440 }
0x2233   :  { %v1443_v44 = vadd.f32 %v1441_v43, %v1433_v18 }
0x2235   :  { %2242 = vtanh.f32 %v1443_v44 }
0x2242   :  { %v2243_v45 = vpop.eup %2242 }
0x2243   :  { %1446 = vrot.lane.b32.xlu1 %v2243_v45, %s2263_s3  ;;  %v1849_v45 = vld [vmem:[%s2763_s8] ss:$0 sm:$0xff] }
0x22b5   :  { %v1447_v19 = vpop.permute.xlu1 %1446 }
0x22b6   :  { %v1449_v46 = vmul.f32 %v2241_v5, %v1447_v19 }
0x22b8   :  { %v2657_v47 = vpack.c.bf16 %v1449_v46, %v1449_v46 }
0x22ba   :  { %1459 = vrot.lane.b32.xlu0 %v2657_v47, %s2264_s30 }
0x232c   :  { %v1460_v48 = vpop.permute.xlu0 %1459 }
0x232d   :  { %2080 = vmatmul.mubr.msk.bf16.vlgmr.msra.gmra.mxu0 %vm182_vm2, %v1460_v48 }
0x23ed   :  { %v1498_v42 = vpop.f32.mrf.mxu0 }
0x23ee   :  { %v1504_v9 = vadd.f32 %v1498_v42, %v959_v50 }
0x23ef   :  { %v2081_v29 = vpop.f32.mrf.mxu0 }
0x23f0   :  { %2244 = vtanh.f32 %v1504_v9  ;;  %v1842_v53 = vmul.f32 -1.442695, %v1504_v9 }
0x23f1   :  { %v1501_v51 = vpop.f32.mrf.mxu0 }
0x23f2   :  { %2246 = vpow2.f32 %v1842_v53 }
0x23f3   :  { %v2082_v52 = vpop.f32.mrf.mxu0 }
0x23fd   :  { %v2245_v13 = vpop.eup %2244 }
0x23fe   :  { %1514 = vrot.lane.b32.xlu1 %v2245_v13, %s2263_s3 }
0x23ff   :  { %v2247_v54 = vpop.eup %2246 }
0x2400   :  { %v1508_v55 = vadd.f32 1.0, %v2247_v54 }
0x2402   :  { %2248 = vrcp.f32 %v1508_v55 }
0x240f   :  { %v2249_v56 = vpop.eup %2248 }
0x2410   :  { %v1512_v15 = vmul.f32 %v2249_v56, %v1443_v44 }
0x2470   :  { %v1515_v57 = vpop.permute.xlu1 %1514 }
0x2471   :  { %v1517_v59 = vmul.f32 %v2249_v56, %v1515_v57 }
0x2473   :  { %1519 = vrot.lane.b32.xlu0 %v1517_v59, %s2264_s30 }
0x24e5   :  { %v1520_v61 = vpop.permute.xlu0 %1519 }
0x24e6   :  { %v1522_v62 = vadd.f32 %v1520_v61, %v1512_v15 }
0x24e8   :  { %2250 = vtanh.f32 %v1522_v62 }
0x24f5   :  { %v2251_v1 = vpop.eup %2250 }
0x24f6   :  { %1525 = vrot.lane.b32.xlu1 %v2251_v1, %s2263_s3 }
0x2568   :  { %v1526_v16 = vpop.permute.xlu1 %1525 }
0x2569   :  { %v1528_v2 = vmul.f32 %v2249_v56, %v1526_v16 }
0x256b   :  { %v1529_v4 = vpack.c.bf16 %v1528_v2, %v1528_v2 }
0x256d   :  { %1538 = vrot.lane.b32.xlu0 %v1529_v4, %s2264_s30 }
0x25df   :  { %v1539_v10 = vpop.permute.xlu0 %1538 }
0x25e0   :  { %2088 = vmatmul.mubr.msk.bf16.vlgmr.msra.gmra.mxu1 %vm182_vm2, %v1539_v10 }
0x26a0   :  { %v1577_v32 = vpop.f32.mrf.mxu1 }
0x26a1   :  { %v1583_v14 = vadd.f32 %v1577_v32, %v962_v11 }
0x26a2   :  { %v2089_v21 = vpop.f32.mrf.mxu1 }
0x26a3   :  { %2252 = vtanh.f32 %v1583_v14  ;;  %v1845_v24 = vmul.f32 -1.442695, %v1583_v14 }
0x26a4   :  { %v1580_v6 = vpop.f32.mrf.mxu1 }
0x26a5   :  { %2254 = vpow2.f32 %v1845_v24 }
0x26a6   :  { %v2090_v22 = vpop.f32.mrf.mxu1 }
0x26b0   :  { %v2253_v17 = vpop.eup %2252 }
0x26b1   :  { %1593 = vrot.lane.b32.xlu1 %v2253_v17, %s2263_s3 }
0x26b2   :  { %v2255_v25 = vpop.eup %2254 }
0x26b3   :  { %v1587_v12 = vadd.f32 1.0, %v2255_v25 }
0x26b5   :  { %2256 = vrcp.f32 %v1587_v12 }
0x26c2   :  { %v2257_v7 = vpop.eup %2256 }
0x26c3   :  { %v1591_v8 = vmul.f32 %v2257_v7, %v1522_v62 }
0x2723   :  { %v1594_v26 = vpop.permute.xlu1 %1593 }
0x2724   :  { %v1596_v23 = vmul.f32 %v2257_v7, %v1594_v26 }
0x2726   :  { %1598 = vrot.lane.b32.xlu0 %v1596_v23, %s2264_s30 }
0x272a   :  { %1059 = vrot.lane.b32.xlu0 %v2545_v34, %s2264_s30 }
0x272e   :  { %1217 = vrot.lane.b32.xlu0 %v2611_v39, %s2264_s30  ;;  %v2126_v39 = vld [vmem:[%s2760_s7 + $0x8] sm:$0xff]   ;;  %s2265_s7 = smov 96  }
0x272f   :  { %2091 = vmatprep.subr.bf16.mxu0 %v2126_v39 }
0x2730   :  { %2092 = vmatpush3.bf16.msra.mxu0 %v2126_v39 }
0x2731   :  { %2093 = vmatprep.subr.bf16.mxu0 %v2127_v60 }
0x2732   :  { %1375 = vrot.lane.b32.xlu0 %v2642_v27, %s2264_s30 }
0x2734   :  { %2094 = vmatpush3.bf16.msra.mxu0 %v2127_v60 }
0x2736   :  { %1533 = vrot.lane.b32.xlu0 %v1529_v4, %s2264_s30 }
0x273a   :  { %828 = vrot.lane.b32.xlu0 %v2574_v63, %s2264_s30 }
0x2798   :  { %v1599_v20 = vpop.permute.xlu0 %1598 }
0x2799   :  { %v1601_v28 = vadd.f32 %v1599_v20, %v1591_v8 }
0x279b   :  { %2258 = vtanh.f32 %v1601_v28 }
0x279c   :  { %v1060_v30 = vpop.permute.xlu0 %1059 }
0x279d   :  { %1062 = vst.msk [vmem:[#allocation3] sm:$0xf] %vm258_vm3, %v1060_v30 }
0x27a0   :  { %v1218_v31 = vpop.permute.xlu0 %1217 }
0x27a1   :  { %1220 = vst.msk [vmem:[#allocation3 + $0x8] sm:$0xf] %vm258_vm3, %v1218_v31 }
0x27a4   :  { %v1376_v34 = vpop.permute.xlu0 %1375 }
0x27a5   :  { %1378 = vst.msk [vmem:[#allocation3 + $0x10] sm:$0xf] %vm258_vm3, %v1376_v34 }
0x27a8   :  { %v2259_v63 = vpop.eup %2258  ;;  %v1534_v27 = vpop.permute.xlu0 %1533 }
0x27a9   :  { %1536 = vst.msk [vmem:[#allocation3 + $0x18] sm:$0xf] %vm258_vm3, %v1534_v27  ;;  %1604 = vrot.lane.b32.xlu1 %v2259_v63, %s2263_s3 }
0x27ac   :  { %v829_v33 = vpop.permute.xlu0 %828 }
0x27ad   :  { %831 = vst.msk [vmem:[%s2761_s10] sm:$0xff] %vm182_vm2, %v829_v33  ;;  %1138 = vrot.lane.b32.xlu1 %v2581_v3, %s2264_s30 }
0x27b1   :  { %1296 = vrot.lane.b32.xlu1 %v2627_v0, %s2264_s30 }
0x27b5   :  { %1454 = vrot.lane.b32.xlu1 %v2657_v47, %s2264_s30 }
0x281b   :  { %v1605_v35 = vpop.permute.xlu1 %1604 }
0x281c   :  { %v1607_v36 = vmul.f32 %v2257_v7, %v1605_v35 }
0x281e   :  { %v1875_v49 = vpack.c.bf16 %v1607_v36, %v1607_v36  ;;  %1617 = vrot.lane.b32.xlu0 %v1607_v36, %s2264_s30 }
0x281f   :  { %v1139_v37 = vpop.permute.xlu1 %1138 }
0x2820   :  { %1141 = vst.msk [vmem:[#allocation3 + $0x4] sm:$0xf] %vm258_vm3, %v1139_v37  ;;  %1612 = vrot.lane.b32.xlu1 %v1875_v49, %s2264_s30 }
0x2823   :  { %v1297_v38 = vpop.permute.xlu1 %1296 }
0x2824   :  { %1299 = vst.msk [vmem:[#allocation3 + $0xc] sm:$0xf] %vm258_vm3, %v1297_v38  ;;  %833 = vrot.lane.b32.xlu1 %v2555_v41, %s2265_s7 }
0x2827   :  { %v1455_v3 = vpop.permute.xlu1 %1454  ;;  %v2128_v0 = vld [vmem:[#allocation3] sm:$0xff]  }
0x2828   :  { %1457 = vst.msk [vmem:[#allocation3 + $0x14] sm:$0xf] %vm258_vm3, %v1455_v3  ;;  %1623 = vrot.lane.b32.xlu1 %v1601_v28, %s2265_s7  ;;  %2095 = vmatprep.mubr.msk.bf16.mxu0 %vm182_vm2, %v2128_v0 }
0x282b   :  { %v2129_v5 = vld [vmem:[#allocation3 + $0x8] sm:$0xff]  }
0x282c   :  { %2096 = vmatmul.mubr.msk.bf16.vlgmr.msra.gmra.mxu0 %vm182_vm2, %v2129_v5 }
0x282f   :  { %v2130_v40 = vld [vmem:[#allocation3 + $0x10] sm:$0xff]  }
0x2830   :  { %2099 = vmatprep.mubr.msk.bf16.mxu0 %vm182_vm2, %v2130_v40 }
0x2890   :  { %v1618_v58 = vpop.permute.xlu0 %1617 }
0x2891   :  { %1847 = vst.msk [vmem:[%s2761_s10 + $0x8] sm:$0xff] %vm182_vm2, %v1618_v58 }
0x2892   :  { %v1613_v41 = vpop.permute.xlu1 %1612 }
0x2893   :  { %1615 = vst.msk [vmem:[#allocation3 + $0x1c] sm:$0xf] %vm258_vm3, %v1613_v41 }
0x2896   :  { %v834_v18 = vpop.permute.xlu1 %833 }
0x2897   :  { %836 = vst.msk [vmem:[%s2762_s11] sm:$0xff] %vm182_vm2, %v834_v18 }
0x289a   :  { %v1624_v43 = vpop.permute.xlu1 %1623  ;;  %v2131_v44 = vld [vmem:[#allocation3 + $0x18] sm:$0xff]  }
0x289b   :  { %1848 = vst.msk [vmem:[%s2762_s11 + $0x8] sm:$0xff] %vm182_vm2, %v1624_v43  ;;  %2100 = vmatmul.mubr.msk.bf16.gmra.mxu0 %vm182_vm2, %v2131_v44 }
0x28ec   :  { %v2097_v19 = vpop.f32.mrf.mxu0 }
0x28ed   :  { %v1734_v46 = vadd.f32 %v2097_v19, %v1849_v45 }
0x28ee   :  { %v1725_v47 = vpop.f32.mrf.mxu0 }
0x28ef   :  { %1758 = vst [vmem:[%s2764_s9 + $0x10] sm:$0xff] %v1734_v46  ;;  %v1726_v48 = vadd.f32 %v1849_v45, %v1725_v47 }
0x28f0   :  { %v2098_v50 = vpop.f32.mrf.mxu0 }
0x28f1   :  { %1756 = vst [vmem:[%s2764_s9] sm:$0xff] %v1726_v48  ;;  %v1737_v42 = vadd.f32 %v2098_v50, %v1849_v45 }
0x28f2   :  { %v1728_v9 = vpop.f32.mrf.mxu0 }
0x28f3   :  { %1759 = vst [vmem:[%s2764_s9 + $0x18] sm:$0xff] %v1737_v42  ;;  %v1729_v29 = vadd.f32 %v1849_v45, %v1728_v9 }
0x28f5   :  { %1757 = vst [vmem:[%s2764_s9 + $0x8] sm:$0xff] %v1729_v29 }
0x295b   :  { %v2101_v51 = vpop.f32.mrf.mxu0 }
0x295c   :  { %v1750_v52 = vadd.f32 %v2101_v51, %v1849_v45 }
0x295d   :  { %v1741_v13 = vpop.f32.mrf.mxu0 }
0x295e   :  { %1762 = vst [vmem:[%s2764_s9 + $0x30] sm:$0xff] %v1750_v52  ;;  %v1742_v53 = vadd.f32 %v1849_v45, %v1741_v13 }
0x295f   :  { %v2102_v54 = vpop.f32.mrf.mxu0 }
0x2960   :  { %1760 = vst [vmem:[%s2764_s9 + $0x20] sm:$0xff] %v1742_v53  ;;  %v1753_v55 = vadd.f32 %v2102_v54, %v1849_v45 }
0x2961   :  { %v1744_v56 = vpop.f32.mrf.mxu0 }
0x2962   :  { %1763 = vst [vmem:[%s2764_s9 + $0x38] sm:$0xff] %v1753_v55  ;;  %v1745_v57 = vadd.f32 %v1849_v45, %v1744_v56 }
0x2964   :  { %1761 = vst [vmem:[%s2764_s9 + $0x28] sm:$0xff] %v1745_v57 }

</bundles_post_ra>
